<compile_context>
chip_gen: v5e
topology: v5e:2x2
jax: 0.10.0
libtpu: 0.0.40
codegen_flags: <defaults>
</compile_context>

<pallas_src>
import functools

import jax
import jax.numpy as jnp
from jax import lax
from jax.experimental import pallas as pl
from jax.experimental.pallas import tpu as pltpu


def _cw_conv_kernel(scale_ref, xd_ref, w_ref, b_ref, out_ref, xpad_ref,
                    *, k, pad, h, w):
    """One block of BC planes, channels-last (H, W, BC), planes on lanes.

    scale_ref : (1, 1, BC)        f32 VMEM   per-plane GAP scale (precomputed)
    xd_ref    : (H, W, BC)        f32 VMEM   unpadded x_d planes
    w_ref     : (k, k)            f32 SMEM   shared 1->1 conv filter
    b_ref     : (1,)              f32 SMEM   conv bias
    out_ref   : (H, W, BC)        f32 VMEM
    xpad_ref  : (H+2p, W+2p, BC)  f32 VMEM scratch (zero-padded stack, in-kernel)
    """
    # Per-plane scaling: planes sit on lanes, so this is a plain per-lane VPU
    # multiply broadcast over H (leading) and W (sublanes).
    xs = xd_ref[...] * scale_ref[...]

    # Build the zero-padded plane stack in VMEM (no padded HBM copy of x_d).
    # Zero every step (not only step 0): scratch is per-core and the grid axis
    # is "parallel", so relying on program_id==0 would be unsafe under megacore.
    if pad > 0:
        xpad_ref[...] = jnp.zeros_like(xpad_ref)
        xpad_ref[pad:pad + h, pad:pad + w, :] = xs
    else:
        xpad_ref[...] = xs

    # PyTorch Conv2d is cross-correlation:
    #   out[y, x, p] = b + sum_ij w[i, j] * xpad[y + i, x + j, p]
    # k is small and static -> fully unrolled scalar-broadcast FMAs on the VPU.
    # All window shifts are leading/sublane offsets; the lane (plane) axis
    # never moves, and the output store is a full-lane-width store.
    acc = jnp.full(out_ref.shape, b_ref[0], dtype=jnp.float32)
    for i in range(k):
        for j in range(k):
            acc = acc + w_ref[i, j] * xpad_ref[i:i + h, j:j + w, :]
    out_ref[...] = acc.astype(out_ref.dtype)


def _choose_plane_block(p, h, w, hp, wp):
    """Pick the per-step plane (lane) block size BC and the padded plane count."""
    if p <= 128:
        # Last block dim equal to the full array dim is always legal.
        return p, p
    # ~20 MiB per-step budget: 2x double-buffered in/out (H,W,BC) blocks + the
    # (Hp,Wp,BC) scratch. Conservative enough for v7x's 64 MiB physical VMEM.
    budget = 20 * 1024 * 1024
    per_plane_bytes = 4 * (4 * h * w + hp * wp)
    bc = budget // max(per_plane_bytes, 1)
    # Multiple of 128 lanes; cap at 512 so large problems keep >= 2 grid steps
    # for the two TensorCores on v7x.
    bc = max(128, min(512, (bc // 128) * 128))
    return bc, pl.cdiv(p, bc) * bc


def channelwise_conv(x, x_d, weight, bias, *, kernel_size, stride=1, padding=0):
    """weight: (k, k) float32 (the single 1->1 Conv2d filter), bias: (1,) float32."""
    assert stride == 1, "ChannelWiseConv requires conv output == input spatial size"
    n, c, h, w = x_d.shape
    assert x.shape[:2] == (n, c)
    hp, wp = h + 2 * padding, w + 2 * padding
    h_out = hp - kernel_size + 1
    w_out = wp - kernel_size + 1
    assert (h_out, w_out) == (h, w), "need 'same' conv (e.g. k=3, padding=1)"

    p = n * c
    bc, p_pad = _choose_plane_block(p, h, w, hp, wp)

    # Glue (plain JAX, fused by XLA): per-plane GAP scale + channels-last
    # relayout so the flattened (N*C) plane index sits on the lane axis.
    scale = jnp.mean(x, axis=(2, 3)).reshape(1, 1, p).astype(jnp.float32)
    xcl = jnp.transpose(x_d, (2, 3, 0, 1)).reshape(h, w, p)
    if p_pad != p:
        scale = jnp.pad(scale, ((0, 0), (0, 0), (0, p_pad - p)))
        xcl = jnp.pad(xcl, ((0, 0), (0, 0), (0, p_pad - p)))

    kern = functools.partial(_cw_conv_kernel,
                             k=kernel_size, pad=padding, h=h, w=w)

    out_cl = pl.pallas_call(
        kern,
        out_shape=jax.ShapeDtypeStruct((h, w, p_pad), x_d.dtype),
        grid=(p_pad // bc,),
        in_specs=[
            # per-plane scale, lanes = planes
            pl.BlockSpec((1, 1, bc), lambda pb: (0, 0, pb)),
            # BC unpadded x_d planes, channels-last
            pl.BlockSpec((h, w, bc), lambda pb: (0, 0, pb)),
            # small conv weight + bias live in SMEM (scalar reads)
            pl.BlockSpec(memory_space=pltpu.MemorySpace.SMEM),
            pl.BlockSpec(memory_space=pltpu.MemorySpace.SMEM),
        ],
        out_specs=pl.BlockSpec((h, w, bc), lambda pb: (0, 0, pb)),
        scratch_shapes=[pltpu.VMEM((hp, wp, bc), jnp.float32)],
        compiler_params=pltpu.CompilerParams(
            dimension_semantics=("parallel",),
            vmem_limit_bytes=40 * 1024 * 1024),
    )(scale, xcl, weight, bias)

    out = out_cl[:, :, :p].reshape(h, w, n, c)
    return jnp.transpose(out, (2, 3, 0, 1))


def channelwise_conv_ref(x, x_d, weight, bias, *, kernel_size, stride, padding):
    """Pure-JAX reference mirroring the PyTorch forward."""
    n, c, h, w = x_d.shape
    scale = jnp.mean(x, axis=(2, 3), keepdims=True)            # AdaptiveAvgPool2d(1)
    xs = (x_d * scale).reshape(n * c, 1, h, w)                  # channels independent
    out = lax.conv_general_dilated(
        xs, weight.reshape(1, 1, kernel_size, kernel_size),
        window_strides=(stride, stride),
        padding=[(padding, padding), (padding, padding)],
        dimension_numbers=("NCHW", "OIHW", "NCHW"))
    return out.reshape(n, c, h, w) + bias[0]


if __name__ == "__main__":
    # Module config: Conv2d(1, out_channels=1, kernel_size=3, stride=1, padding=1)
    kernel_size, stride, padding = 3, 1, 1
    N, C, H, W = 2, 4, 16, 16     # in_channels = C = 4

    key = jax.random.PRNGKey(0)
    kx, kxd, kw, kb = jax.random.split(key, 4)
    x   = jax.random.normal(kx,  (N, C, H, W), dtype=jnp.float32)
    x_d = jax.random.normal(kxd, (N, C, H, W), dtype=jnp.float32)
    # Deterministic synthetic Conv2d(1,1,k,k) parameters (weight + bias).
    weight = jax.random.normal(kw, (kernel_size, kernel_size), dtype=jnp.float32) * 0.1
    bias   = jax.random.normal(kb, (1,), dtype=jnp.float32) * 0.1

    out = channelwise_conv(x, x_d, weight, bias,
                           kernel_size=kernel_size, stride=stride, padding=padding)
    out = jax.block_until_ready(out)

    ref = channelwise_conv_ref(x, x_d, weight, bias,
                               kernel_size=kernel_size, stride=stride, padding=padding)
    assert out.shape == (N, C, H, W)
    assert jnp.allclose(out, ref, atol=1e-5, rtol=1e-5), "mismatch vs reference"

    print("KERNEL_OK")
</pallas_src>

<mosaic_0001>
module attributes {stable_mosaic.version = 11 : i64} {
  func.func @_cw_conv_kernel(%arg0: i32, %arg1: memref<1x1x8xf32, #tpu.memory_space<vmem>>, %arg2: memref<16x16x8xf32, #tpu.memory_space<vmem>>, %arg3: memref<3x3xf32, #tpu.memory_space<smem>>, %arg4: memref<1xf32, #tpu.memory_space<smem>>, %arg5: memref<16x16x8xf32, #tpu.memory_space<vmem>>, %arg6: memref<18x18x8xf32, #tpu.memory_space<vmem>>) attributes {dimension_semantics = [#tpu.dimension_semantics<parallel>], iteration_bounds = array<i64: 1>, scalar_prefetch = 0 : i64, scratch_operands = 1 : i64, tpu.core_type = #tpu.core_type<tc>, window_params = [{transform_indices = @transform_0, window_bounds = array<i64: 1, 1, 8>}, {transform_indices = @transform_1, window_bounds = array<i64: 16, 16, 8>}, {transform_indices = @transform_2, window_bounds = array<i64: 3, 3>}, {transform_indices = @transform_3, window_bounds = array<i64: 1>}, {transform_indices = @transform_4, window_bounds = array<i64: 16, 16, 8>}]} {
    %c0 = arith.constant 0 : index
    %c0_0 = arith.constant 0 : index
    %c0_1 = arith.constant 0 : index
    %0 = vector.load %arg2[%c0, %c0_0, %c0_1] : memref<16x16x8xf32, #tpu.memory_space<vmem>>, vector<16x16x8xf32>
    %c0_2 = arith.constant 0 : index
    %c0_3 = arith.constant 0 : index
    %c0_4 = arith.constant 0 : index
    %1 = vector.load %arg1[%c0_2, %c0_3, %c0_4] : memref<1x1x8xf32, #tpu.memory_space<vmem>>, vector<1x1x8xf32>
    %2 = vector.broadcast %1 : vector<1x1x8xf32> to vector<16x16x8xf32>
    %3 = arith.mulf %0, %2 : vector<16x16x8xf32>
    %cst = arith.constant 0.000000e+00 : f32
    %4 = vector.broadcast %cst : f32 to vector<18x18x8xf32>
    %c0_5 = arith.constant 0 : index
    %c0_6 = arith.constant 0 : index
    %c0_7 = arith.constant 0 : index
    %5 = vector.load %arg6[%c0_5, %c0_6, %c0_7] : memref<18x18x8xf32, #tpu.memory_space<vmem>>, vector<18x18x8xf32>
    tpu.vector_store %arg6[%c0_5, %c0_6, %c0_7], %4 {strides = array<i32>} : memref<18x18x8xf32, #tpu.memory_space<vmem>>, vector<18x18x8xf32>,
    %c1 = arith.constant 1 : index
    %c1_8 = arith.constant 1 : index
    %c0_9 = arith.constant 0 : index
    %6 = vector.load %arg6[%c1, %c1_8, %c0_9] : memref<18x18x8xf32, #tpu.memory_space<vmem>>, vector<16x16x8xf32>
    tpu.vector_store %arg6[%c1, %c1_8, %c0_9], %3 {strides = array<i32>} : memref<18x18x8xf32, #tpu.memory_space<vmem>>, vector<16x16x8xf32>,
    %c0_10 = arith.constant 0 : index
    %7 = memref.load %arg4[%c0_10] : memref<1xf32, #tpu.memory_space<smem>>
    %8 = vector.broadcast %7 : f32 to vector<16x16x8xf32>
    %c0_11 = arith.constant 0 : index
    %c0_12 = arith.constant 0 : index
    %9 = memref.load %arg3[%c0_11, %c0_12] : memref<3x3xf32, #tpu.memory_space<smem>>
    %c0_13 = arith.constant 0 : index
    %c0_14 = arith.constant 0 : index
    %c0_15 = arith.constant 0 : index
    %10 = vector.load %arg6[%c0_13, %c0_14, %c0_15] : memref<18x18x8xf32, #tpu.memory_space<vmem>>, vector<16x16x8xf32>
    %11 = vector.broadcast %9 : f32 to vector<16x16x8xf32>
    %12 = arith.mulf %11, %10 : vector<16x16x8xf32>
    %13 = arith.addf %8, %12 : vector<16x16x8xf32>
    %c0_16 = arith.constant 0 : index
    %c1_17 = arith.constant 1 : index
    %14 = memref.load %arg3[%c0_16, %c1_17] : memref<3x3xf32, #tpu.memory_space<smem>>
    %c0_18 = arith.constant 0 : index
    %c1_19 = arith.constant 1 : index
    %c0_20 = arith.constant 0 : index
    %15 = vector.load %arg6[%c0_18, %c1_19, %c0_20] : memref<18x18x8xf32, #tpu.memory_space<vmem>>, vector<16x16x8xf32>
    %16 = vector.broadcast %14 : f32 to vector<16x16x8xf32>
    %17 = arith.mulf %16, %15 : vector<16x16x8xf32>
    %18 = arith.addf %13, %17 : vector<16x16x8xf32>
    %c0_21 = arith.constant 0 : index
    %c2 = arith.constant 2 : index
    %19 = memref.load %arg3[%c0_21, %c2] : memref<3x3xf32, #tpu.memory_space<smem>>
    %c0_22 = arith.constant 0 : index
    %c2_23 = arith.constant 2 : index
    %c0_24 = arith.constant 0 : index
    %20 = vector.load %arg6[%c0_22, %c2_23, %c0_24] : memref<18x18x8xf32, #tpu.memory_space<vmem>>, vector<16x16x8xf32>
    %21 = vector.broadcast %19 : f32 to vector<16x16x8xf32>
    %22 = arith.mulf %21, %20 : vector<16x16x8xf32>
    %23 = arith.addf %18, %22 : vector<16x16x8xf32>
    %c1_25 = arith.constant 1 : index
    %c0_26 = arith.constant 0 : index
    %24 = memref.load %arg3[%c1_25, %c0_26] : memref<3x3xf32, #tpu.memory_space<smem>>
    %c1_27 = arith.constant 1 : index
    %c0_28 = arith.constant 0 : index
    %c0_29 = arith.constant 0 : index
    %25 = vector.load %arg6[%c1_27, %c0_28, %c0_29] : memref<18x18x8xf32, #tpu.memory_space<vmem>>, vector<16x16x8xf32>
    %26 = vector.broadcast %24 : f32 to vector<16x16x8xf32>
    %27 = arith.mulf %26, %25 : vector<16x16x8xf32>
    %28 = arith.addf %23, %27 : vector<16x16x8xf32>
    %c1_30 = arith.constant 1 : index
    %c1_31 = arith.constant 1 : index
    %29 = memref.load %arg3[%c1_30, %c1_31] : memref<3x3xf32, #tpu.memory_space<smem>>
    %c1_32 = arith.constant 1 : index
    %c1_33 = arith.constant 1 : index
    %c0_34 = arith.constant 0 : index
    %30 = vector.load %arg6[%c1_32, %c1_33, %c0_34] : memref<18x18x8xf32, #tpu.memory_space<vmem>>, vector<16x16x8xf32>
    %31 = vector.broadcast %29 : f32 to vector<16x16x8xf32>
    %32 = arith.mulf %31, %30 : vector<16x16x8xf32>
    %33 = arith.addf %28, %32 : vector<16x16x8xf32>
    %c1_35 = arith.constant 1 : index
    %c2_36 = arith.constant 2 : index
    %34 = memref.load %arg3[%c1_35, %c2_36] : memref<3x3xf32, #tpu.memory_space<smem>>
    %c1_37 = arith.constant 1 : index
    %c2_38 = arith.constant 2 : index
    %c0_39 = arith.constant 0 : index
    %35 = vector.load %arg6[%c1_37, %c2_38, %c0_39] : memref<18x18x8xf32, #tpu.memory_space<vmem>>, vector<16x16x8xf32>
    %36 = vector.broadcast %34 : f32 to vector<16x16x8xf32>
    %37 = arith.mulf %36, %35 : vector<16x16x8xf32>
    %38 = arith.addf %33, %37 : vector<16x16x8xf32>
    %c2_40 = arith.constant 2 : index
    %c0_41 = arith.constant 0 : index
    %39 = memref.load %arg3[%c2_40, %c0_41] : memref<3x3xf32, #tpu.memory_space<smem>>
    %c2_42 = arith.constant 2 : index
    %c0_43 = arith.constant 0 : index
    %c0_44 = arith.constant 0 : index
    %40 = vector.load %arg6[%c2_42, %c0_43, %c0_44] : memref<18x18x8xf32, #tpu.memory_space<vmem>>, vector<16x16x8xf32>
    %41 = vector.broadcast %39 : f32 to vector<16x16x8xf32>
    %42 = arith.mulf %41, %40 : vector<16x16x8xf32>
    %43 = arith.addf %38, %42 : vector<16x16x8xf32>
    %c2_45 = arith.constant 2 : index
    %c1_46 = arith.constant 1 : index
    %44 = memref.load %arg3[%c2_45, %c1_46] : memref<3x3xf32, #tpu.memory_space<smem>>
    %c2_47 = arith.constant 2 : index
    %c1_48 = arith.constant 1 : index
    %c0_49 = arith.constant 0 : index
    %45 = vector.load %arg6[%c2_47, %c1_48, %c0_49] : memref<18x18x8xf32, #tpu.memory_space<vmem>>, vector<16x16x8xf32>
    %46 = vector.broadcast %44 : f32 to vector<16x16x8xf32>
    %47 = arith.mulf %46, %45 : vector<16x16x8xf32>
    %48 = arith.addf %43, %47 : vector<16x16x8xf32>
    %c2_50 = arith.constant 2 : index
    %c2_51 = arith.constant 2 : index
    %49 = memref.load %arg3[%c2_50, %c2_51] : memref<3x3xf32, #tpu.memory_space<smem>>
    %c2_52 = arith.constant 2 : index
    %c2_53 = arith.constant 2 : index
    %c0_54 = arith.constant 0 : index
    %50 = vector.load %arg6[%c2_52, %c2_53, %c0_54] : memref<18x18x8xf32, #tpu.memory_space<vmem>>, vector<16x16x8xf32>
    %51 = vector.broadcast %49 : f32 to vector<16x16x8xf32>
    %52 = arith.mulf %51, %50 : vector<16x16x8xf32>
    %53 = arith.addf %48, %52 : vector<16x16x8xf32>
    %c0_55 = arith.constant 0 : index
    %c0_56 = arith.constant 0 : index
    %c0_57 = arith.constant 0 : index
    %54 = vector.load %arg5[%c0_55, %c0_56, %c0_57] : memref<16x16x8xf32, #tpu.memory_space<vmem>>, vector<16x16x8xf32>
    tpu.vector_store %arg5[%c0_55, %c0_56, %c0_57], %53 {strides = array<i32>} : memref<16x16x8xf32, #tpu.memory_space<vmem>>, vector<16x16x8xf32>,
    return
  }
  func.func @transform_0(%arg0: i32) -> (i32, i32, i32) {
    %c0_i32 = arith.constant 0 : i32
    %c0_i32_0 = arith.constant 0 : i32
    %c0_i32_1 = arith.constant 0 : i32
    return %c0_i32, %c0_i32_0, %arg0 : i32, i32, i32
  }
  func.func @transform_1(%arg0: i32) -> (i32, i32, i32) {
    %c0_i32 = arith.constant 0 : i32
    %c0_i32_0 = arith.constant 0 : i32
    %c0_i32_1 = arith.constant 0 : i32
    return %c0_i32, %c0_i32_0, %arg0 : i32, i32, i32
  }
  func.func @transform_2(%arg0: i32) -> (i32, i32) {
    %c0_i32 = arith.constant 0 : i32
    %c0_i32_0 = arith.constant 0 : i32
    %c0_i32_1 = arith.constant 0 : i32
    return %c0_i32, %c0_i32_0 : i32, i32
  }
  func.func @transform_3(%arg0: i32) -> i32 {
    %c0_i32 = arith.constant 0 : i32
    %c0_i32_0 = arith.constant 0 : i32
    return %c0_i32 : i32
  }
  func.func @transform_4(%arg0: i32) -> (i32, i32, i32) {
    %c0_i32 = arith.constant 0 : i32
    %c0_i32_0 = arith.constant 0 : i32
    %c0_i32_1 = arith.constant 0 : i32
    return %c0_i32, %c0_i32_0, %arg0 : i32, i32, i32
  }
}

</mosaic_0001>

<bundles_post_ra>
// kernel: tpu_custom_call.1
= control target key start
LH: loop header
LB: loop body
LE: loop exit
PB: predicated region body
PF: predicated region fallthrough
CT: control target
= control target key end

     0   :  { %10 = vsyncpa [#allocation5], 0  ;;  %s1135_s18 = smov [#allocation4]   ;;  %s2137_s0 = inlined_call_operand.vmem [shape: f32[1,1,8], index: 0, kind: input, shape index: {}]   ;;  %s2138_s1 = inlined_call_operand.vmem [shape: f32[16,16,8], index: 1, kind: input, shape index: {}]   ;;  %s2139_s2 = inlined_call_operand.vmem [shape: f32[3,3], index: 2, kind: input, shape index: {}]   ;;  %s2140_s3 = inlined_call_operand.<no memory space> [shape: f32[1], index: 3, kind: input, shape index: {}]   ;;  %s2141_s4 = inlined_call_operand.vmem [shape: f32[16,16,8], index: 4, kind: output, shape index: {}]  }
   0x1   :  { %s20_s17 = sshll.u32 %s2139_s2, 4  ;;  %s21_s17 = int_to_ptr.vmem [resolvable:$true] %s20_s17 }
   0x2   :  { %23 = dma.vmem_to_smem %s21_s17, 64, %s1135_s18, [#allocation5]  }
   0x3   :  { %1133 = dma.done.wait [#allocation5], 64  }
   0x4   :  { %1134 = vsyncadd [#allocation5], 4294967232 }
   0x5   :  { %30 = sfence }
   0x6   :  { %vm99_vm0 = vcmask 64512   ;;  %v1136_v0 = vmov 0.0   ;;  %vm102_vm1 = vcmask 58368   ;;  %s1253_s2 = sld [smem:[#allocation4]]  ;;  %v1268_v1 = vld [vmem:[%s2137_s0] ss:$0 sm:$0xff]  ;;  %v1347_v26 = vstv %s2140_s3 }
   0x7   :  { %100 = vst.msk [vmem:[#allocation2] sm:$0xff] %vm99_vm0, %v1136_v0  ;;  %s1257_s19 = sld [smem:[#allocation4 + $0x1]]  ;;  %v31_v2 = vld [vmem:[%s2138_s1] sm:$0xff]  ;;  %v32_v3 = vld [vmem:[%s2138_s1 + $0x8] sm:$0xff]  ;;  %v33_v4 = vld [vmem:[%s2138_s1 + $0x10] sm:$0xff] }
   0x8   :  { %101 = vst.msk [vmem:[#allocation2 + $0x8] sm:$0xff] %vm99_vm0, %v1136_v0  ;;  %s1261_s20 = sld [smem:[#allocation4 + $0x2]]  ;;  %v34_v5 = vld [vmem:[%s2138_s1 + $0x18] sm:$0xff]  ;;  %v35_v6 = vld [vmem:[%s2138_s1 + $0x20] sm:$0xff]  ;;  %v36_v7 = vld [vmem:[%s2138_s1 + $0x28] sm:$0xff]  ;;  %v67_v9 = vmul.f32 %v1268_v1, %v31_v2  ;;  %v68_v13 = vmul.f32 %v1268_v1, %v32_v3  ;;  %v69_v14 = vmul.f32 %v1268_v1, %v33_v4 }
   0x9   :  { %104 = vst.msk [vmem:[#allocation2 + $0x18] sm:$0xff] %vm99_vm0, %v1136_v0  ;;  %s1270_s23 = sld [smem:[#allocation4 + $0x80]]  ;;  %v37_v8 = vld [vmem:[%s2138_s1 + $0x30] sm:$0xff]  ;;  %v38_v10 = vld [vmem:[%s2138_s1 + $0x38] sm:$0xff]  ;;  %v39_v11 = vld [vmem:[%s2138_s1 + $0x40] sm:$0xff]  ;;  %v70_v18 = vmul.f32 %v1268_v1, %v34_v5  ;;  %v71_v19 = vmul.f32 %v1268_v1, %v35_v6  ;;  %v72_v20 = vmul.f32 %v1268_v1, %v36_v7 }
   0xa   :  { %105 = vst.msk [vmem:[#allocation2 + $0x20] sm:$0xff] %vm99_vm0, %v1136_v0  ;;  %s1277_s26 = sld [smem:[#allocation4 + $0x81]]  ;;  %v40_v12 = vld [vmem:[%s2138_s1 + $0x48] sm:$0xff]  ;;  %v41_v15 = vld [vmem:[%s2138_s1 + $0x50] sm:$0xff]  ;;  %v42_v16 = vld [vmem:[%s2138_s1 + $0x58] sm:$0xff]  ;;  %v73_v21 = vmul.f32 %v1268_v1, %v37_v8  ;;  %v74_v25 = vmul.f32 %v1268_v1, %v38_v10  ;;  %v75_v32 = vmul.f32 %v1268_v1, %v39_v11 }
   0xb   :  { %107 = vst.msk [vmem:[#allocation2 + $0x30] sm:$0xff] %vm99_vm0, %v1136_v0  ;;  %v43_v17 = vld [vmem:[%s2138_s1 + $0x60] sm:$0xff]  ;;  %v44_v22 = vld [vmem:[%s2138_s1 + $0x68] sm:$0xff]  ;;  %v45_v23 = vld [vmem:[%s2138_s1 + $0x70] sm:$0xff]  ;;  %s1365_s3 = sld [smem:[#allocation4 + $0x82]]  ;;  %v76_v39 = vmul.f32 %v1268_v1, %v40_v12  ;;  %v1370_v40 = vmul.f32 %v1268_v1, %v41_v15  ;;  %v1373_v41 = vmul.f32 %v1268_v1, %v42_v16 }
   0xc   :  { %108 = vst.msk [vmem:[#allocation2 + $0x38] sm:$0xff] %vm99_vm0, %v1136_v0  ;;  %v46_v24 = vld [vmem:[%s2138_s1 + $0x78] sm:$0xff]  ;;  %v1350_v28 = vstv %s1253_s2  ;;  %v47_v33 = vld [vmem:[%s2138_s1 + $0x80] sm:$0xff]  ;;  %v1376_v42 = vmul.f32 %v1268_v1, %v43_v17  ;;  %v48_v43 = vld [vmem:[%s2138_s1 + $0x88] sm:$0xff]  ;;  %v1385_v45 = vmul.f32 %v1268_v1, %v44_v22  ;;  %s1398_s17 = sld [smem:[#allocation4 + $0x101]]  ;;  %v1403_v52 = vmul.f32 %v1268_v1, %v45_v23 }
   0xd   :  { %110 = vst.msk [vmem:[#allocation2 + $0x48] sm:$0xff] %vm99_vm0, %v1136_v0  ;;  %v1353_v30 = vstv %s1257_s19  ;;  %v49_v46 = vld [vmem:[%s2138_s1 + $0x90] sm:$0xff]  ;;  %v50_v47 = vld [vmem:[%s2138_s1 + $0x98] sm:$0xff]  ;;  %v51_v48 = vld [vmem:[%s2138_s1 + $0xa0] sm:$0xff]  ;;  %v1406_v53 = vmul.f32 %v1268_v1, %v46_v24  ;;  %v1409_v54 = vmul.f32 %v1268_v1, %v47_v33  ;;  %s1417_s25 = sld [smem:[#allocation4 + $0x102]]  ;;  %v1422_v58 = vmul.f32 %v1268_v1, %v48_v43 }
   0xe   :  { %111 = vst.msk [vmem:[#allocation2 + $0x50] sm:$0xff] %vm99_vm0, %v1136_v0  ;;  %v191_v27 = vld [vmem:[#allocation2] sm:$0xff]  ;;  %v1363_v36 = vstv %s1261_s20  ;;  %s1381_s20 = sld [smem:[#allocation4 + $0x100]]  ;;  %v52_v55 = vld [vmem:[%s2138_s1 + $0xa8] sm:$0xff]  ;;  %v53_v56 = vld [vmem:[%s2138_s1 + $0xb0] sm:$0xff]  ;;  %v1437_v2 = vmul.f32 %v1268_v1, %v49_v46  ;;  %v1440_v3 = vmul.f32 %v1268_v1, %v50_v47  ;;  %v1443_v4 = vmul.f32 %v1268_v1, %v51_v48 }
   0xf   :  { %113 = vst.msk [vmem:[#allocation2 + $0x60] sm:$0xff] %vm99_vm0, %v1136_v0  ;;  %v289_v29 = vld [vmem:[#allocation2 + $0x1] sm:$0xff]  ;;  %v224_v34 = vmul.f32 %v1350_v28, %v191_v27  ;;  %v54_v59 = vld [vmem:[%s2138_s1 + $0xb8] sm:$0xff]  ;;  %v57_v5 = vld [vmem:[%s2138_s1 + $0xd0] sm:$0xff]  ;;  %v1449_v6 = vstv %s1270_s23  ;;  %v1453_v7 = vmul.f32 %v1268_v1, %v52_v55  ;;  %v1456_v8 = vmul.f32 %v1268_v1, %v53_v56 }
  0x10   :  { %114 = vst.msk [vmem:[#allocation2 + $0x68] sm:$0xff] %vm99_vm0, %v1136_v0  ;;  %v387_v31 = vld [vmem:[#allocation2 + $0x2] sm:$0xff]  ;;  %v322_v35 = vmul.f32 %v1353_v30, %v289_v29 }
  0x11   :  { %116 = vst.msk [vmem:[#allocation2 + $0x78] sm:$0xff] %vm99_vm0, %v1136_v0  ;;  %v192_v37 = vld [vmem:[#allocation2 + $0x8] sm:$0xff]  ;;  %v256_v49 = vadd.f32 %v224_v34, %v1347_v26  ;;  %v420_v50 = vmul.f32 %v1363_v36, %v387_v31  ;;  %v55_v60 = vld [vmem:[%s2138_s1 + $0xc0] sm:$0xff] }
  0x12   :  { %117 = vst.msk [vmem:[#allocation2 + $0x80] sm:$0xff] %vm99_vm0, %v1136_v0  ;;  %v225_v51 = vmul.f32 %v1350_v28, %v192_v37  ;;  %v56_v61 = vld [vmem:[%s2138_s1 + $0xc8] sm:$0xff]  ;;  %v59_v10 = vld [vmem:[%s2138_s1 + $0xe0] sm:$0xff]  ;;  %v62_v37 = vld [vmem:[%s2138_s1 + $0xf8] sm:$0xff]  ;;  %v1515_v46 = vstv %s1398_s17 }
  0x13   :  { %119 = vst.msk [vmem:[#allocation2 + $0x90] sm:$0xff] %vm99_vm0, %v1136_v0  ;;  %v354_v62 = vadd.f32 %v322_v35, %v256_v49  ;;  %v1472_v15 = vmul.f32 %v1268_v1, %v56_v61  ;;  %v60_v16 = vld [vmem:[%s2138_s1 + $0xe8] sm:$0xff]  ;;  %v1491_v29 = vmul.f32 %v1268_v1, %v59_v10  ;;  %v61_v35 = vld [vmem:[%s2138_s1 + $0xf0] sm:$0xff]  ;;  %v1518_v47 = vstv %s1417_s25 }
  0x14   :  { %120 = vst.msk [vmem:[#allocation2 + $0x98] sm:$0xff] %vm99_vm0, %v1136_v0  ;;  %v257_v63 = vadd.f32 %v225_v51, %v1347_v26  ;;  %v1500_v34 = vmul.f32 %v1268_v1, %v60_v16  ;;  %v1510_v43 = vstv %s1381_s20 }
  0x15   :  { %122 = vst.msk [vmem:[#allocation2 + $0xa8] sm:$0xff] %vm99_vm0, %v1136_v0  ;;  %v452_v11 = vadd.f32 %v420_v50, %v354_v62 }
  0x16   :  { %123 = vst.msk [vmem:[#allocation2 + $0xb0] sm:$0xff] %vm99_vm0, %v1136_v0 }
  0x17   :  { %125 = vst.msk [vmem:[#allocation2 + $0xc0] sm:$0xff] %vm99_vm0, %v1136_v0 }
  0x18   :  { %126 = vst.msk [vmem:[#allocation2 + $0xc8] sm:$0xff] %vm99_vm0, %v1136_v0 }
  0x19   :  { %128 = vst.msk [vmem:[#allocation2 + $0xd8] sm:$0xff] %vm99_vm0, %v1136_v0 }
  0x1a   :  { %129 = vst.msk [vmem:[#allocation2 + $0xe0] sm:$0xff] %vm99_vm0, %v1136_v0 }
  0x1b   :  { %131 = vst.msk [vmem:[#allocation2 + $0xf0] sm:$0xff] %vm99_vm0, %v1136_v0 }
  0x1c   :  { %132 = vst.msk [vmem:[#allocation2 + $0xf8] sm:$0xff] %vm99_vm0, %v1136_v0 }
  0x1d   :  { %134 = vst.msk [vmem:[#allocation2 + $0x108] sm:$0xff] %vm99_vm0, %v1136_v0 }
  0x1e   :  { %135 = vst.msk [vmem:[#allocation2 + $0x110] sm:$0xff] %vm99_vm0, %v1136_v0 }
  0x1f   :  { %137 = vst.msk [vmem:[#allocation2 + $0x120] sm:$0xff] %vm99_vm0, %v1136_v0 }
  0x20   :  { %138 = vst.msk [vmem:[#allocation2 + $0x128] sm:$0xff] %vm99_vm0, %v1136_v0 }
  0x21   :  { %140 = vst.msk [vmem:[#allocation2 + $0x138] sm:$0xff] %vm99_vm0, %v1136_v0 }
  0x22   :  { %141 = vst.msk [vmem:[#allocation2 + $0x140] sm:$0xff] %vm99_vm0, %v1136_v0 }
  0x23   :  { %143 = vst.msk [vmem:[#allocation2 + $0x150] sm:$0xff] %vm99_vm0, %v1136_v0 }
  0x24   :  { %144 = vst.msk [vmem:[#allocation2 + $0x158] sm:$0xff] %vm99_vm0, %v1136_v0 }
  0x25   :  { %146 = vst.msk [vmem:[#allocation2 + $0x168] sm:$0xff] %vm99_vm0, %v1136_v0 }
  0x26   :  { %147 = vst.msk [vmem:[#allocation2 + $0x170] sm:$0xff] %vm99_vm0, %v1136_v0 }
  0x27   :  { %149 = vst.msk [vmem:[#allocation2 + $0x180] sm:$0xff] %vm99_vm0, %v1136_v0 }
  0x28   :  { %150 = vst.msk [vmem:[#allocation2 + $0x188] sm:$0xff] %vm99_vm0, %v1136_v0 }
  0x29   :  { %152 = vst.msk [vmem:[#allocation2 + $0x198] sm:$0xff] %vm99_vm0, %v1136_v0 }
  0x2a   :  { %153 = vst.msk [vmem:[#allocation2 + $0x1a0] sm:$0xff] %vm99_vm0, %v1136_v0 }
  0x2b   :  { %103 = vst.msk [vmem:[#allocation2 + $0x10] sm:$0x3] %vm102_vm1, %v1136_v0 }
  0x2c   :  { %106 = vst.msk [vmem:[#allocation2 + $0x28] sm:$0x3] %vm102_vm1, %v1136_v0 }
  0x2d   :  { %109 = vst.msk [vmem:[#allocation2 + $0x40] sm:$0x3] %vm102_vm1, %v1136_v0 }
  0x2e   :  { %112 = vst.msk [vmem:[#allocation2 + $0x58] sm:$0x3] %vm102_vm1, %v1136_v0 }
  0x2f   :  { %115 = vst.msk [vmem:[#allocation2 + $0x70] sm:$0x3] %vm102_vm1, %v1136_v0 }
  0x30   :  { %118 = vst.msk [vmem:[#allocation2 + $0x88] sm:$0x3] %vm102_vm1, %v1136_v0 }
  0x31   :  { %121 = vst.msk [vmem:[#allocation2 + $0xa0] sm:$0x3] %vm102_vm1, %v1136_v0 }
  0x32   :  { %124 = vst.msk [vmem:[#allocation2 + $0xb8] sm:$0x3] %vm102_vm1, %v1136_v0  ;;  %v290_v38 = vld [vmem:[#allocation2 + $0x9] sm:$0xff] }
  0x33   :  { %127 = vst.msk [vmem:[#allocation2 + $0xd0] sm:$0x3] %vm102_vm1, %v1136_v0  ;;  %v388_v44 = vld [vmem:[#allocation2 + $0xa] sm:$0xff]  ;;  %v323_v57 = vmul.f32 %v1353_v30, %v290_v38 }
  0x34   :  { %130 = vst.msk [vmem:[#allocation2 + $0xe8] sm:$0x3] %vm102_vm1, %v1136_v0 }
  0x35   :  { %133 = vst.msk [vmem:[#allocation2 + $0x100] sm:$0x3] %vm102_vm1, %v1136_v0  ;;  %v355_v12 = vadd.f32 %v323_v57, %v257_v63 }
  0x36   :  { %136 = vst.msk [vmem:[#allocation2 + $0x118] sm:$0x3] %vm102_vm1, %v1136_v0 }
  0x37   :  { %139 = vst.msk [vmem:[#allocation2 + $0x130] sm:$0x3] %vm102_vm1, %v1136_v0 }
  0x38   :  { %142 = vst.msk [vmem:[#allocation2 + $0x148] sm:$0x3] %vm102_vm1, %v1136_v0 }
  0x39   :  { %145 = vst.msk [vmem:[#allocation2 + $0x160] sm:$0x3] %vm102_vm1, %v1136_v0 }
  0x3a   :  { %148 = vst.msk [vmem:[#allocation2 + $0x178] sm:$0x3] %vm102_vm1, %v1136_v0 }
  0x3b   :  { %151 = vst.msk [vmem:[#allocation2 + $0x190] sm:$0x3] %vm102_vm1, %v1136_v0 }
  0x3c   :  { %154 = vst.msk [vmem:[#allocation2 + $0x1a8] sm:$0x3] %vm102_vm1, %v1136_v0  ;;  %v421_v0 = vmul.f32 %v1363_v36, %v388_v44 }
  0x3d   :  { %156 = vst.msk [vmem:[#allocation2 + $0x19] sm:$0xff] %vm99_vm0, %v67_v9  ;;  %v58_v9 = vld [vmem:[%s2138_s1 + $0xd8] sm:$0xff] }
  0x3e   :  { %157 = vst.msk [vmem:[#allocation2 + $0x21] sm:$0xff] %vm99_vm0, %v68_v13  ;;  %v1466_v13 = vmul.f32 %v1268_v1, %v54_v59  ;;  %v453_v22 = vadd.f32 %v421_v0, %v355_v12  ;;  %v1488_v27 = vmul.f32 %v1268_v1, %v58_v9  ;;  %v1531_v59 = vmul.f32 %v1268_v1, %v61_v35 }
  0x3f   :  { %158 = vst.msk [vmem:[#allocation2 + $0x31] sm:$0xff] %vm99_vm0, %v69_v14  ;;  %v1469_v14 = vmul.f32 %v1268_v1, %v55_v60  ;;  %v1534_v60 = vmul.f32 %v1268_v1, %v62_v37 }
  0x40   :  { %159 = vst.msk [vmem:[#allocation2 + $0x39] sm:$0xff] %vm99_vm0, %v70_v18 }
  0x41   :  { %160 = vst.msk [vmem:[#allocation2 + $0x49] sm:$0xff] %vm99_vm0, %v71_v19  ;;  %v1478_v19 = vstv %s1277_s26 }
  0x42   :  { %161 = vst.msk [vmem:[#allocation2 + $0x51] sm:$0xff] %vm99_vm0, %v72_v20  ;;  %v1482_v20 = vmul.f32 %v1268_v1, %v57_v5 }
  0x43   :  { %162 = vst.msk [vmem:[#allocation2 + $0x61] sm:$0xff] %vm99_vm0, %v73_v21 }
  0x44   :  { %163 = vst.msk [vmem:[#allocation2 + $0x69] sm:$0xff] %vm99_vm0, %v74_v25  ;;  %v485_v17 = vld [vmem:[#allocation2 + $0x18] sm:$0xff] }
  0x45   :  { %v583_v18 = vld [vmem:[#allocation2 + $0x19] sm:$0xff]  ;;  %164 = vst.msk [vmem:[#allocation2 + $0x79] sm:$0xff] %vm99_vm0, %v75_v32  ;;  %v518_v21 = vmul.f32 %v1449_v6, %v485_v17  ;;  %v584_v24 = vld [vmem:[#allocation2 + $0x21] sm:$0xff]  ;;  %v226_v25 = vmul.f32 %v485_v17, %v1350_v28  ;;  %v1494_v32 = vstv %s1365_s3 }
  0x46   :  { %v486_v23 = vld [vmem:[#allocation2 + $0x20] sm:$0xff]  ;;  %165 = vst.msk [vmem:[#allocation2 + $0x81] sm:$0xff] %vm99_vm0, %v76_v39  ;;  %v616_v39 = vmul.f32 %v1478_v19, %v583_v18  ;;  %v617_v49 = vmul.f32 %v1478_v19, %v584_v24  ;;  %v878_v55 = vld [vmem:[#allocation2 + $0x31] sm:$0xff] }
  0x47   :  { %v681_v31 = vld [vmem:[#allocation2 + $0x1a] sm:$0xff]  ;;  %v519_v33 = vmul.f32 %v1449_v6, %v486_v23  ;;  %166 = vst.msk [vmem:[#allocation2 + $0x91] sm:$0xff] %vm99_vm0, %v1370_v40  ;;  %v550_v38 = vadd.f32 %v518_v21, %v452_v11  ;;  %v682_v44 = vld [vmem:[#allocation2 + $0x22] sm:$0xff]  ;;  %v780_v40 = vld [vmem:[#allocation2 + $0x30] sm:$0xff]  ;;  %v258_v57 = vadd.f32 %v226_v25, %v1347_v26  ;;  %v911_v1 = vmul.f32 %v1515_v46, %v878_v55 }
  0x48   :  { %167 = vst.msk [vmem:[#allocation2 + $0x99] sm:$0xff] %vm99_vm0, %v1373_v41  ;;  %v714_v51 = vmul.f32 %v1494_v32, %v681_v31  ;;  %v1524_v56 = vld [vmem:[#allocation2 + $0x32] sm:$0xff]  ;;  %v324_v41 = vmul.f32 %v583_v18, %v1353_v30  ;;  %v715_v61 = vmul.f32 %v1494_v32, %v682_v44  ;;  %v813_v5 = vmul.f32 %v1510_v43, %v780_v40  ;;  %v1560_v21 = vld [vmem:[#allocation2 + $0x48] sm:$0xff] }
  0x49   :  { %v551_v48 = vadd.f32 %v519_v33, %v453_v22  ;;  %168 = vst.msk [vmem:[#allocation2 + $0xa9] sm:$0xff] %vm99_vm0, %v1376_v42  ;;  %v648_v50 = vadd.f32 %v616_v39, %v550_v38  ;;  %v1537_v62 = vld [vmem:[#allocation2 + $0x38] sm:$0xff]  ;;  %v422_v10 = vmul.f32 %v681_v31, %v1363_v36  ;;  %v1009_v11 = vmul.f32 %v1518_v47, %v1524_v56  ;;  %v1566_v25 = vld [vmem:[#allocation2 + $0x49] sm:$0xff] }
  0x4a   :  { %169 = vst.msk [vmem:[#allocation2 + $0xb1] sm:$0xff] %vm99_vm0, %v1385_v45  ;;  %v1539_v63 = vld [vmem:[#allocation2 + $0x39] sm:$0xff]  ;;  %v356_v9 = vadd.f32 %v324_v41, %v258_v57  ;;  %v227_v16 = vmul.f32 %v486_v23, %v1350_v28  ;;  %v325_v33 = vmul.f32 %v584_v24, %v1353_v30  ;;  %v618_v38 = vmul.f32 %v878_v55, %v1478_v19  ;;  %v1591_v57 = vld [vmem:[#allocation2 + $0x50] sm:$0xff] }
  0x4b   :  { %v649_v42 = vadd.f32 %v617_v49, %v551_v48  ;;  %170 = vst.msk [vmem:[#allocation2 + $0xc1] sm:$0xff] %vm99_vm0, %v1403_v52  ;;  %v746_v0 = vadd.f32 %v714_v51, %v648_v50  ;;  %v1544_v45 = vld [vmem:[#allocation2 + $0x3a] sm:$0xff]  ;;  %v814_v52 = vmul.f32 %v1510_v43, %v1537_v62  ;;  %v912_v17 = vmul.f32 %v1515_v46, %v1539_v63  ;;  %v1595_v41 = vld [vmem:[#allocation2 + $0x51] sm:$0xff] }
  0x4c   :  { %171 = vst.msk [vmem:[#allocation2 + $0xc9] sm:$0xff] %vm99_vm0, %v1406_v53  ;;  %v454_v18 = vadd.f32 %v422_v10, %v356_v9  ;;  %v520_v53 = vmul.f32 %v780_v40, %v1449_v6  ;;  %v1010_v23 = vmul.f32 %v1518_v47, %v1544_v45  ;;  %v259_v31 = vadd.f32 %v227_v16, %v1347_v26 }
  0x4d   :  { %v747_v12 = vadd.f32 %v715_v61, %v649_v42  ;;  %172 = vst.msk [vmem:[#allocation2 + $0xd9] sm:$0xff] %vm99_vm0, %v1409_v54  ;;  %v845_v22 = vadd.f32 %v813_v5, %v746_v0  ;;  %v1568_v54 = vld [vmem:[#allocation2 + $0x4a] sm:$0xff]  ;;  %v815_v39 = vmul.f32 %v1510_v43, %v1560_v21  ;;  %v423_v49 = vmul.f32 %v682_v44, %v1363_v36 }
  0x4e   :  { %173 = vst.msk [vmem:[#allocation2 + $0xe1] sm:$0xff] %vm99_vm0, %v1422_v58  ;;  %v552_v37 = vadd.f32 %v520_v53, %v454_v18  ;;  %v716_v58 = vmul.f32 %v1524_v56, %v1494_v32  ;;  %v357_v48 = vadd.f32 %v325_v33, %v259_v31  ;;  %v228_v24 = vmul.f32 %v780_v40, %v1350_v28  ;;  %v1629_v33 = vld [vmem:[#allocation2 + $0x61] sm:$0xff] }
  0x4f   :  { %174 = vst.msk [vmem:[#allocation2 + $0xf1] sm:$0xff] %vm99_vm0, %v1437_v2  ;;  %v846_v35 = vadd.f32 %v814_v52, %v747_v12  ;;  %v913_v50 = vmul.f32 %v1515_v46, %v1566_v25  ;;  %v1011_v51 = vmul.f32 %v1518_v47, %v1568_v54  ;;  %v943_v44 = vadd.f32 %v911_v1, %v845_v22 }
  0x50   :  { %175 = vst.msk [vmem:[#allocation2 + $0xf9] sm:$0xff] %vm99_vm0, %v1440_v3  ;;  %v650_v2 = vadd.f32 %v618_v38, %v552_v37  ;;  %v521_v3 = vmul.f32 %v1537_v62, %v1449_v6  ;;  %v455_v40 = vadd.f32 %v423_v49, %v357_v48  ;;  %v260_v42 = vadd.f32 %v228_v24, %v1347_v26  ;;  %v1644_v38 = vld [vmem:[#allocation2 + $0x62] sm:$0xff] }
  0x51   :  { %176 = vst.msk [vmem:[#allocation2 + $0x109] sm:$0xff] %vm99_vm0, %v1443_v4  ;;  %v1597_v4 = vld [vmem:[#allocation2 + $0x52] sm:$0xff]  ;;  %v326_v61 = vmul.f32 %v878_v55, %v1353_v30  ;;  %v944_v0 = vadd.f32 %v912_v17, %v846_v35  ;;  %v619_v9 = vmul.f32 %v1539_v63, %v1478_v19  ;;  %v816_v1 = vmul.f32 %v1510_v43, %v1591_v57 }
  0x52   :  { %177 = vst.msk [vmem:[#allocation2 + $0x111] sm:$0xff] %vm99_vm0, %v1453_v7  ;;  %v748_v5 = vadd.f32 %v716_v58, %v650_v2  ;;  %v717_v7 = vmul.f32 %v1544_v45, %v1494_v32  ;;  %v553_v10 = vadd.f32 %v521_v3, %v455_v40  ;;  %v424_v55 = vmul.f32 %v1524_v56, %v1363_v36  ;;  %v883_v40 = vld [vmem:[#allocation2 + $0x69] sm:$0xff] }
  0x53   :  { %178 = vst.msk [vmem:[#allocation2 + $0x121] sm:$0xff] %vm99_vm0, %v1456_v8  ;;  %v358_v12 = vadd.f32 %v326_v61, %v260_v42  ;;  %v914_v16 = vmul.f32 %v1515_v46, %v1595_v41  ;;  %v1012_v52 = vmul.f32 %v1518_v47, %v1597_v4  ;;  %v1041_v17 = vadd.f32 %v1009_v11, %v943_v44 }
  0x54   :  { %179 = vst.msk [vmem:[#allocation2 + $0x129] sm:$0xff] %vm99_vm0, %v1466_v13  ;;  %v847_v8 = vadd.f32 %v815_v39, %v748_v5  ;;  %v229_v13 = vmul.f32 %v1537_v62, %v1350_v28  ;;  %v651_v18 = vadd.f32 %v619_v9, %v553_v10  ;;  %v522_v56 = vmul.f32 %v1560_v21, %v1449_v6 }
  0x55   :  { %180 = vst.msk [vmem:[#allocation2 + $0x139] sm:$0xff] %vm99_vm0, %v1469_v14  ;;  %v456_v53 = vadd.f32 %v424_v55, %v358_v12  ;;  %v1625_v14 = vld [vmem:[#allocation2 + $0x60] sm:$0xff]  ;;  %v1042_v22 = vadd.f32 %v1010_v23, %v944_v0  ;;  %v620_v37 = vmul.f32 %v1566_v25, %v1478_v19  ;;  %v230_v58 = vmul.f32 %v1560_v21, %v1350_v28 }
  0x56   :  { %181 = vst.msk [vmem:[#allocation2 + $0x141] sm:$0xff] %vm99_vm0, %v1472_v15  ;;  %v945_v31 = vadd.f32 %v913_v50, %v847_v8  ;;  %v261_v62 = vadd.f32 %v229_v13, %v1347_v26  ;;  %v327_v15 = vmul.f32 %v1539_v63, %v1353_v30  ;;  %v749_v11 = vadd.f32 %v717_v7, %v651_v18  ;;  %v884_v18 = vld [vmem:[#allocation2 + $0x79] sm:$0xff] }
  0x57   :  { %182 = vst.msk [vmem:[#allocation2 + $0x151] sm:$0xff] %vm99_vm0, %v1482_v20  ;;  %v554_v35 = vadd.f32 %v522_v56, %v456_v53  ;;  %v718_v20 = vmul.f32 %v1568_v54, %v1494_v32  ;;  %v817_v23 = vmul.f32 %v1510_v43, %v1625_v14  ;;  %v523_v49 = vmul.f32 %v1591_v57, %v1449_v6 }
  0x58   :  { %183 = vst.msk [vmem:[#allocation2 + $0x159] sm:$0xff] %vm99_vm0, %v1488_v27  ;;  %v359_v63 = vadd.f32 %v327_v15, %v261_v62  ;;  %v425_v27 = vmul.f32 %v1544_v45, %v1363_v36  ;;  %v848_v39 = vadd.f32 %v816_v1, %v749_v11  ;;  %v1043_v24 = vadd.f32 %v1011_v51, %v945_v31  ;;  %v785_v51 = vld [vmem:[#allocation2 + $0x68] sm:$0xff] }
  0x59   :  { %184 = vst.msk [vmem:[#allocation2 + $0x169] sm:$0xff] %vm99_vm0, %v1491_v29  ;;  %v652_v48 = vadd.f32 %v620_v37, %v554_v35  ;;  %v915_v29 = vmul.f32 %v1515_v46, %v1629_v33  ;;  %v262_v45 = vadd.f32 %v230_v58, %v1347_v26  ;;  %v328_v21 = vmul.f32 %v1566_v25, %v1353_v30  ;;  %v982_v35 = vld [vmem:[#allocation2 + $0x7a] sm:$0xff] }
  0x5a   :  { %185 = vst.msk [vmem:[#allocation2 + $0x171] sm:$0xff] %vm99_vm0, %v1500_v34  ;;  %v457_v2 = vadd.f32 %v425_v27, %v359_v63  ;;  %v946_v34 = vadd.f32 %v914_v16, %v848_v39  ;;  %v1013_v3 = vmul.f32 %v1518_v47, %v1644_v38  ;;  %v621_v44 = vmul.f32 %v1595_v41, %v1478_v19 }
  0x5b   :  { %186 = vst.msk [vmem:[#allocation2 + $0x181] sm:$0xff] %vm99_vm0, %v1531_v59  ;;  %v750_v50 = vadd.f32 %v718_v20, %v652_v48  ;;  %v360_v25 = vadd.f32 %v328_v21, %v262_v45  ;;  %v231_v42 = vmul.f32 %v1591_v57, %v1350_v28  ;;  %v719_v5 = vmul.f32 %v1597_v4, %v1494_v32  ;;  %v981_v57 = vld [vmem:[#allocation2 + $0x6a] sm:$0xff] }
  0x5c   :  { %187 = vst.msk [vmem:[#allocation2 + $0x189] sm:$0xff] %vm99_vm0, %v1534_v60  ;;  %v555_v59 = vadd.f32 %v523_v49, %v457_v2  ;;  %v426_v60 = vmul.f32 %v1568_v54, %v1363_v36  ;;  %v1044_v61 = vadd.f32 %v1012_v52, %v946_v34  ;;  %v524_v9 = vmul.f32 %v1625_v14, %v1449_v6  ;;  %v787_v49 = vld [vmem:[#allocation2 + $0x80] sm:$0xff] }
  0x5d   :  { %1073 = vst.msk [vmem:[%s2141_s4] sm:$0xff] %vm99_vm0, %v1041_v17  ;;  %v849_v0 = vadd.f32 %v817_v23, %v750_v50  ;;  %v263_v10 = vadd.f32 %v231_v42, %v1347_v26  ;;  %v329_v1 = vmul.f32 %v1595_v41, %v1353_v30  ;;  %v818_v55 = vmul.f32 %v1510_v43, %v785_v51  ;;  %v786_v17 = vld [vmem:[#allocation2 + $0x78] sm:$0xff] }
  0x5e   :  { %1074 = vst.msk [vmem:[%s2141_s4 + $0x8] sm:$0xff] %vm99_vm0, %v1042_v22  ;;  %v653_v54 = vadd.f32 %v621_v44, %v555_v59  ;;  %v458_v7 = vadd.f32 %v426_v60, %v360_v25  ;;  %v916_v8 = vmul.f32 %v1515_v46, %v883_v40  ;;  %v622_v16 = vmul.f32 %v1629_v33, %v1478_v19  ;;  %v983_v44 = vld [vmem:[#allocation2 + $0x82] sm:$0xff] }
  0x5f   :  { %1075 = vst.msk [vmem:[%s2141_s4 + $0x10] sm:$0xff] %vm99_vm0, %v1043_v24  ;;  %v947_v12 = vadd.f32 %v915_v29, %v849_v0  ;;  %v361_v53 = vadd.f32 %v329_v1, %v263_v10  ;;  %v427_v41 = vmul.f32 %v1597_v4, %v1363_v36  ;;  %v1014_v22 = vmul.f32 %v1518_v47, %v981_v57  ;;  %v885_v24 = vld [vmem:[#allocation2 + $0x81] sm:$0xff] }
  0x60   :  { %1076 = vst.msk [vmem:[%s2141_s4 + $0x18] sm:$0xff] %vm99_vm0, %v1044_v61  ;;  %v751_v52 = vadd.f32 %v719_v5, %v653_v54  ;;  %v556_v13 = vadd.f32 %v524_v9, %v458_v7  ;;  %v720_v31 = vmul.f32 %v1644_v38, %v1494_v32  ;;  %v232_v62 = vmul.f32 %v1625_v14, %v1350_v28  ;;  %v788_v54 = vld [vmem:[#allocation2 + $0x90] sm:$0xff] }
  0x61   :  { %v1045_v56 = vadd.f32 %v1013_v3, %v947_v12  ;;  %v459_v37 = vadd.f32 %v427_v41, %v361_v53  ;;  %v525_v20 = vmul.f32 %v785_v51, %v1449_v6  ;;  %v819_v4 = vmul.f32 %v1510_v43, %v786_v17 }
  0x62   :  { %v850_v15 = vadd.f32 %v818_v55, %v751_v52  ;;  %v654_v11 = vadd.f32 %v622_v16, %v556_v13  ;;  %v917_v23 = vmul.f32 %v1515_v46, %v884_v18  ;;  %v264_v63 = vadd.f32 %v232_v62, %v1347_v26  ;;  %v886_v55 = vld [vmem:[#allocation2 + $0x91] sm:$0xff] }
  0x63   :  { %1077 = vst.msk [vmem:[%s2141_s4 + $0x20] sm:$0xff] %vm99_vm0, %v1045_v56  ;;  %v330_v14 = vmul.f32 %v1629_v33, %v1353_v30  ;;  %v557_v39 = vadd.f32 %v525_v20, %v459_v37  ;;  %v623_v48 = vmul.f32 %v883_v40, %v1478_v19  ;;  %v1015_v29 = vmul.f32 %v1518_v47, %v982_v35  ;;  %v984_v13 = vld [vmem:[#allocation2 + $0x92] sm:$0xff] }
  0x64   :  { %v948_v27 = vadd.f32 %v916_v8, %v850_v15  ;;  %v752_v58 = vadd.f32 %v720_v31, %v654_v11  ;;  %v428_v45 = vmul.f32 %v1644_v38, %v1363_v36  ;;  %v233_v21 = vmul.f32 %v785_v51, %v1350_v28  ;;  %v789_v37 = vld [vmem:[#allocation2 + $0x98] sm:$0xff] }
  0x65   :  { %v362_v2 = vadd.f32 %v330_v14, %v264_v63  ;;  %v655_v3 = vadd.f32 %v623_v48, %v557_v39  ;;  %v721_v33 = vmul.f32 %v981_v57, %v1494_v32  ;;  %v526_v25 = vmul.f32 %v786_v17, %v1449_v6  ;;  %v1745_v20 = vld [vmem:[#allocation2 + $0x99] sm:$0xff] }
  0x66   :  { %v1046_v34 = vadd.f32 %v1014_v22, %v948_v27  ;;  %v851_v50 = vadd.f32 %v819_v4, %v752_v58  ;;  %v265_v60 = vadd.f32 %v233_v21, %v1347_v26  ;;  %v331_v42 = vmul.f32 %v883_v40, %v1353_v30 }
  0x67   :  { %v460_v59 = vadd.f32 %v428_v45, %v362_v2  ;;  %v753_v51 = vadd.f32 %v721_v33, %v655_v3  ;;  %v820_v61 = vmul.f32 %v1510_v43, %v787_v49  ;;  %v918_v0 = vmul.f32 %v1515_v46, %v885_v24 }
  0x68   :  { %1078 = vst.msk [vmem:[%s2141_s4 + $0x28] sm:$0xff] %vm99_vm0, %v1046_v34  ;;  %v949_v38 = vadd.f32 %v917_v23, %v851_v50  ;;  %v624_v9 = vmul.f32 %v884_v18, %v1478_v19  ;;  %v363_v7 = vadd.f32 %v331_v42, %v265_v60  ;;  %v429_v10 = vmul.f32 %v981_v57, %v1363_v36  ;;  %v790_v50 = vld [vmem:[#allocation2 + $0xa8] sm:$0xff] }
  0x69   :  { %v558_v5 = vadd.f32 %v526_v25, %v460_v59  ;;  %v852_v40 = vadd.f32 %v820_v61, %v753_v51  ;;  %v1016_v12 = vmul.f32 %v1518_v47, %v983_v44  ;;  %v234_v8 = vmul.f32 %v786_v17, %v1350_v28  ;;  %v888_v51 = vld [vmem:[#allocation2 + $0xa9] sm:$0xff] }
  0x6a   :  { %v1047_v1 = vadd.f32 %v1015_v29, %v949_v38  ;;  %v722_v52 = vmul.f32 %v982_v35, %v1494_v32  ;;  %v461_v53 = vadd.f32 %v429_v10, %v363_v7  ;;  %v527_v41 = vmul.f32 %v787_v49, %v1449_v6  ;;  %v1767_v61 = vld [vmem:[#allocation2 + $0xaa] sm:$0xff] }
  0x6b   :  { %v656_v16 = vadd.f32 %v624_v9, %v558_v5  ;;  %v950_v57 = vadd.f32 %v918_v0, %v852_v40  ;;  %v821_v56 = vmul.f32 %v1510_v43, %v788_v54  ;;  %v266_v22 = vadd.f32 %v234_v8, %v1347_v26  ;;  %v791_v40 = vld [vmem:[#allocation2 + $0xb0] sm:$0xff] }
  0x6c   :  { %1079 = vst.msk [vmem:[%s2141_s4 + $0x30] sm:$0xff] %vm99_vm0, %v1047_v1  ;;  %v332_v31 = vmul.f32 %v884_v18, %v1353_v30  ;;  %v919_v62 = vmul.f32 %v1515_v46, %v886_v55  ;;  %v559_v15 = vadd.f32 %v527_v41, %v461_v53  ;;  %v625_v11 = vmul.f32 %v885_v24, %v1478_v19  ;;  %v1750_v18 = vld [vmem:[#allocation2 + $0x9a] sm:$0xff]  ;;  %v889_v41 = vld [vmem:[#allocation2 + $0xb1] sm:$0xff] }
  0x6d   :  { %v754_v17 = vadd.f32 %v722_v52, %v656_v16  ;;  %v1048_v4 = vadd.f32 %v1016_v12, %v950_v57  ;;  %v1017_v23 = vmul.f32 %v1518_v47, %v984_v13  ;;  %v430_v14 = vmul.f32 %v982_v35, %v1363_v36 }
  0x6e   :  { %v364_v63 = vadd.f32 %v332_v31, %v266_v22  ;;  %v657_v58 = vadd.f32 %v625_v11, %v559_v15  ;;  %v723_v39 = vmul.f32 %v983_v44, %v1494_v32  ;;  %v235_v48 = vmul.f32 %v787_v49, %v1350_v28  ;;  %v1784_v22 = vld [vmem:[#allocation2 + $0xb2] sm:$0xff] }
  0x6f   :  { %v853_v27 = vadd.f32 %v821_v56, %v754_v17  ;;  %1080 = vst.msk [vmem:[%s2141_s4 + $0x38] sm:$0xff] %vm99_vm0, %v1048_v4  ;;  %v822_v29 = vmul.f32 %v1510_v43, %v789_v37  ;;  %v920_v2 = vmul.f32 %v1515_v46, %v1745_v20  ;;  %v528_v35 = vmul.f32 %v788_v54, %v1449_v6 }
  0x70   :  { %v462_v45 = vadd.f32 %v430_v14, %v364_v63  ;;  %v755_v34 = vadd.f32 %v723_v39, %v657_v58  ;;  %v267_v3 = vadd.f32 %v235_v48, %v1347_v26  ;;  %v333_v49 = vmul.f32 %v885_v24, %v1353_v30  ;;  %v792_v58 = vld [vmem:[#allocation2 + $0xc0] sm:$0xff] }
  0x71   :  { %v951_v21 = vadd.f32 %v919_v62, %v853_v27  ;;  %v1018_v33 = vmul.f32 %v1518_v47, %v1750_v18  ;;  %v626_v25 = vmul.f32 %v886_v55, %v1478_v19  ;;  %v431_v60 = vmul.f32 %v983_v44, %v1363_v36  ;;  %v1799_v39 = vld [vmem:[#allocation2 + $0xc1] sm:$0xff] }
  0x72   :  { %v560_v59 = vadd.f32 %v528_v35, %v462_v45  ;;  %v854_v38 = vadd.f32 %v822_v29, %v755_v34  ;;  %v365_v0 = vadd.f32 %v333_v49, %v267_v3  ;;  %v236_v5 = vmul.f32 %v788_v54, %v1350_v28  ;;  %v1807_v34 = vld [vmem:[#allocation2 + $0xc2] sm:$0xff] }
  0x73   :  { %v1049_v42 = vadd.f32 %v1017_v23, %v951_v21  ;;  %v724_v7 = vmul.f32 %v984_v13, %v1494_v32  ;;  %v823_v24 = vmul.f32 %v1510_v43, %v790_v50  ;;  %v529_v10 = vmul.f32 %v789_v37, %v1449_v6 }
  0x74   :  { %v658_v9 = vadd.f32 %v626_v25, %v560_v59  ;;  %v952_v44 = vadd.f32 %v920_v2, %v854_v38  ;;  %v463_v1 = vadd.f32 %v431_v60, %v365_v0  ;;  %v268_v12 = vadd.f32 %v236_v5, %v1347_v26 }
  0x75   :  { %1081 = vst.msk [vmem:[%s2141_s4 + $0x40] sm:$0xff] %vm99_vm0, %v1049_v42  ;;  %v334_v8 = vmul.f32 %v886_v55, %v1353_v30  ;;  %v921_v16 = vmul.f32 %v1515_v46, %v888_v51  ;;  %v1019_v52 = vmul.f32 %v1518_v47, %v1767_v61  ;;  %v627_v53 = vmul.f32 %v1745_v20, %v1478_v19 }
  0x76   :  { %v756_v54 = vadd.f32 %v724_v7, %v658_v9  ;;  %v1050_v57 = vadd.f32 %v1018_v33, %v952_v44  ;;  %v561_v56 = vadd.f32 %v529_v10, %v463_v1  ;;  %v432_v17 = vmul.f32 %v984_v13, %v1363_v36  ;;  %v793_v10 = vld [vmem:[#allocation2 + $0xc8] sm:$0xff] }
  0x77   :  { %v366_v31 = vadd.f32 %v334_v8, %v268_v12  ;;  %v725_v55 = vmul.f32 %v1750_v18, %v1494_v32  ;;  %v824_v15 = vmul.f32 %v1510_v43, %v791_v40  ;;  %v237_v11 = vmul.f32 %v789_v37, %v1350_v28  ;;  %v891_v44 = vld [vmem:[#allocation2 + $0xc9] sm:$0xff] }
  0x78   :  { %v855_v62 = vadd.f32 %v823_v24, %v756_v54  ;;  %1082 = vst.msk [vmem:[%s2141_s4 + $0x48] sm:$0xff] %vm99_vm0, %v1050_v57  ;;  %v659_v4 = vadd.f32 %v627_v53, %v561_v56  ;;  %v922_v23 = vmul.f32 %v1515_v46, %v889_v41  ;;  %v530_v14 = vmul.f32 %v790_v50, %v1449_v6  ;;  %v989_v57 = vld [vmem:[#allocation2 + $0xca] sm:$0xff] }
  0x79   :  { %v464_v63 = vadd.f32 %v432_v17, %v366_v31  ;;  %v1020_v27 = vmul.f32 %v1518_v47, %v1784_v22  ;;  %v269_v37 = vadd.f32 %v237_v11, %v1347_v26  ;;  %v335_v48 = vmul.f32 %v1745_v20, %v1353_v30 }
  0x7a   :  { %v953_v13 = vadd.f32 %v921_v16, %v855_v62  ;;  %v757_v29 = vadd.f32 %v725_v55, %v659_v4  ;;  %v628_v45 = vmul.f32 %v888_v51, %v1478_v19  ;;  %v726_v35 = vmul.f32 %v1767_v61, %v1494_v32  ;;  %v794_v4 = vld [vmem:[#allocation2 + $0xd8] sm:$0xff] }
  0x7b   :  { %v562_v2 = vadd.f32 %v530_v14, %v464_v63  ;;  %v367_v3 = vadd.f32 %v335_v48, %v269_v37  ;;  %v433_v49 = vmul.f32 %v1750_v18, %v1363_v36  ;;  %v238_v33 = vmul.f32 %v790_v50, %v1350_v28 }
  0x7c   :  { %v1051_v21 = vadd.f32 %v1019_v52, %v953_v13  ;;  %v856_v59 = vadd.f32 %v824_v15, %v757_v29  ;;  %v825_v20 = vmul.f32 %v1510_v43, %v792_v58  ;;  %v923_v60 = vmul.f32 %v1515_v46, %v1799_v39 }
  0x7d   :  { %v660_v25 = vadd.f32 %v628_v45, %v562_v2  ;;  %v465_v42 = vadd.f32 %v433_v49, %v367_v3  ;;  %v531_v38 = vmul.f32 %v791_v40, %v1449_v6  ;;  %v270_v0 = vadd.f32 %v238_v33, %v1347_v26  ;;  %v990_v2 = vld [vmem:[#allocation2 + $0xda] sm:$0xff] }
  0x7e   :  { %1083 = vst.msk [vmem:[%s2141_s4 + $0x50] sm:$0xff] %vm99_vm0, %v1051_v21  ;;  %v336_v18 = vmul.f32 %v888_v51, %v1353_v30  ;;  %v954_v50 = vadd.f32 %v922_v23, %v856_v59  ;;  %v1021_v9 = vmul.f32 %v1518_v47, %v1807_v34  ;;  %v629_v7 = vmul.f32 %v889_v41, %v1478_v19  ;;  %v892_v23 = vld [vmem:[#allocation2 + $0xd9] sm:$0xff] }
  0x7f   :  { %v758_v5 = vadd.f32 %v726_v35, %v660_v25  ;;  %v563_v24 = vadd.f32 %v531_v38, %v465_v42  ;;  %v434_v12 = vmul.f32 %v1767_v61, %v1363_v36  ;;  %v239_v8 = vmul.f32 %v791_v40, %v1350_v28  ;;  %v893_v42 = vld [vmem:[#allocation2 + $0xe1] sm:$0xff] }
  0x80   :  { %v368_v1 = vadd.f32 %v336_v18, %v270_v0  ;;  %v1052_v54 = vadd.f32 %v1020_v27, %v954_v50  ;;  %v727_v51 = vmul.f32 %v1784_v22, %v1494_v32  ;;  %v532_v52 = vmul.f32 %v792_v58, %v1449_v6 }
  0x81   :  { %v857_v16 = vadd.f32 %v825_v20, %v758_v5  ;;  %v661_v53 = vadd.f32 %v629_v7, %v563_v24  ;;  %v271_v31 = vadd.f32 %v239_v8, %v1347_v26  ;;  %v337_v17 = vmul.f32 %v889_v41, %v1353_v30  ;;  %v991_v7 = vld [vmem:[#allocation2 + $0xe2] sm:$0xff] }
  0x82   :  { %v466_v56 = vadd.f32 %v434_v12, %v368_v1  ;;  %1084 = vst.msk [vmem:[%s2141_s4 + $0x58] sm:$0xff] %vm99_vm0, %v1052_v54  ;;  %v826_v40 = vmul.f32 %v1510_v43, %v793_v10  ;;  %v924_v62 = vmul.f32 %v1515_v46, %v891_v44  ;;  %v630_v55 = vmul.f32 %v1799_v39, %v1478_v19 }
  0x83   :  { %v955_v61 = vadd.f32 %v923_v60, %v857_v16  ;;  %v759_v15 = vadd.f32 %v727_v51, %v661_v53  ;;  %v369_v63 = vadd.f32 %v337_v17, %v271_v31  ;;  %v435_v41 = vmul.f32 %v1784_v22, %v1363_v36  ;;  %v795_v60 = vld [vmem:[#allocation2 + $0xe0] sm:$0xff]  ;;  %v796_v53 = vld [vmem:[#allocation2 + $0xf0] sm:$0xff] }
  0x84   :  { %v564_v11 = vadd.f32 %v532_v52, %v466_v56  ;;  %v1022_v13 = vmul.f32 %v1518_v47, %v989_v57  ;;  %v728_v27 = vmul.f32 %v1807_v34, %v1494_v32  ;;  %v240_v37 = vmul.f32 %v792_v58, %v1350_v28 }
  0x85   :  { %v1053_v14 = vadd.f32 %v1021_v9, %v955_v61  ;;  %v858_v48 = vadd.f32 %v826_v40, %v759_v15  ;;  %v467_v45 = vadd.f32 %v435_v41, %v369_v63  ;;  %v533_v35 = vmul.f32 %v793_v10, %v1449_v6  ;;  %v894_v40 = vld [vmem:[#allocation2 + $0xf1] sm:$0xff] }
  0x86   :  { %v662_v29 = vadd.f32 %v630_v55, %v564_v11  ;;  %v827_v22 = vmul.f32 %v1510_v43, %v794_v4  ;;  %v925_v21 = vmul.f32 %v1515_v46, %v892_v23  ;;  %v272_v3 = vadd.f32 %v240_v37, %v1347_v26  ;;  %v992_v11 = vld [vmem:[#allocation2 + $0xf2] sm:$0xff] }
  0x87   :  { %1085 = vst.msk [vmem:[%s2141_s4 + $0x60] sm:$0xff] %vm99_vm0, %v1053_v14  ;;  %v338_v58 = vmul.f32 %v1799_v39, %v1353_v30  ;;  %v956_v49 = vadd.f32 %v924_v62, %v858_v48  ;;  %v565_v59 = vadd.f32 %v533_v35, %v467_v45  ;;  %v631_v25 = vmul.f32 %v891_v44, %v1478_v19  ;;  %v797_v45 = vld [vmem:[#allocation2 + $0xf8] sm:$0xff] }
  0x88   :  { %v760_v33 = vadd.f32 %v728_v27, %v662_v29  ;;  %v1023_v20 = vmul.f32 %v1518_v47, %v990_v2  ;;  %v436_v0 = vmul.f32 %v1807_v34, %v1363_v36  ;;  %v241_v18 = vmul.f32 %v793_v10, %v1350_v28  ;;  %v1887_v35 = vld [vmem:[#allocation2 + $0xf9] sm:$0xff] }
  0x89   :  { %v370_v38 = vadd.f32 %v338_v58, %v272_v3  ;;  %v1054_v50 = vadd.f32 %v1022_v13, %v956_v49  ;;  %v663_v9 = vadd.f32 %v631_v25, %v565_v59  ;;  %v729_v39 = vmul.f32 %v989_v57, %v1494_v32 }
  0x8a   :  { %v859_v5 = vadd.f32 %v827_v22, %v760_v33  ;;  %v534_v1 = vmul.f32 %v794_v4, %v1449_v6  ;;  %v273_v12 = vadd.f32 %v241_v18, %v1347_v26  ;;  %v339_v8 = vmul.f32 %v891_v44, %v1353_v30 }
  0x8b   :  { %v468_v24 = vadd.f32 %v436_v0, %v370_v38  ;;  %1086 = vst.msk [vmem:[%s2141_s4 + $0x68] sm:$0xff] %vm99_vm0, %v1054_v50  ;;  %v761_v10 = vadd.f32 %v729_v39, %v663_v9  ;;  %v828_v54 = vmul.f32 %v1510_v43, %v795_v60  ;;  %v926_v16 = vmul.f32 %v1515_v46, %v893_v42 }
  0x8c   :  { %v957_v34 = vadd.f32 %v925_v21, %v859_v5  ;;  %v632_v52 = vmul.f32 %v892_v23, %v1478_v19  ;;  %v371_v56 = vadd.f32 %v339_v8, %v273_v12  ;;  %v437_v31 = vmul.f32 %v989_v57, %v1363_v36  ;;  %v798_v5 = vld [vmem:[#allocation2 + $0x108] sm:$0xff] }
  0x8d   :  { %v566_v51 = vadd.f32 %v534_v1, %v468_v24  ;;  %v860_v44 = vadd.f32 %v828_v54, %v761_v10  ;;  %v1024_v61 = vmul.f32 %v1518_v47, %v991_v7  ;;  %v242_v62 = vmul.f32 %v794_v4, %v1350_v28  ;;  %v896_v10 = vld [vmem:[#allocation2 + $0x109] sm:$0xff] }
  0x8e   :  { %v1055_v17 = vadd.f32 %v1023_v20, %v957_v34  ;;  %v730_v15 = vmul.f32 %v990_v2, %v1494_v32  ;;  %v469_v63 = vadd.f32 %v437_v31, %v371_v56  ;;  %v535_v41 = vmul.f32 %v795_v60, %v1449_v6  ;;  %v1909_v54 = vld [vmem:[#allocation2 + $0x10a] sm:$0xff] }
  0x8f   :  { %v664_v55 = vadd.f32 %v632_v52, %v566_v51  ;;  %v958_v57 = vadd.f32 %v926_v16, %v860_v44  ;;  %v829_v14 = vmul.f32 %v1510_v43, %v796_v53  ;;  %v274_v13 = vadd.f32 %v242_v62, %v1347_v26  ;;  %v799_v44 = vld [vmem:[#allocation2 + $0x110] sm:$0xff] }
  0x90   :  { %1087 = vst.msk [vmem:[%s2141_s4 + $0x70] sm:$0xff] %vm99_vm0, %v1055_v17  ;;  %v340_v27 = vmul.f32 %v892_v23, %v1353_v30  ;;  %v927_v37 = vmul.f32 %v1515_v46, %v894_v40  ;;  %v567_v48 = vadd.f32 %v535_v41, %v469_v63  ;;  %v633_v29 = vmul.f32 %v893_v42, %v1478_v19  ;;  %v1892_v23 = vld [vmem:[#allocation2 + $0xfa] sm:$0xff]  ;;  %v897_v41 = vld [vmem:[#allocation2 + $0x111] sm:$0xff] }
  0x91   :  { %v762_v4 = vadd.f32 %v730_v15, %v664_v55  ;;  %v1056_v22 = vadd.f32 %v1024_v61, %v958_v57  ;;  %v1025_v21 = vmul.f32 %v1518_v47, %v992_v11  ;;  %v438_v58 = vmul.f32 %v990_v2, %v1363_v36 }
  0x92   :  { %v372_v3 = vadd.f32 %v340_v27, %v274_v13  ;;  %v665_v33 = vadd.f32 %v633_v29, %v567_v48  ;;  %v731_v59 = vmul.f32 %v991_v7, %v1494_v32  ;;  %v243_v25 = vmul.f32 %v795_v60, %v1350_v28  ;;  %v1926_v13 = vld [vmem:[#allocation2 + $0x112] sm:$0xff] }
  0x93   :  { %v861_v49 = vadd.f32 %v829_v14, %v762_v4  ;;  %1088 = vst.msk [vmem:[%s2141_s4 + $0x78] sm:$0xff] %vm99_vm0, %v1056_v22  ;;  %v830_v20 = vmul.f32 %v1510_v43, %v797_v45  ;;  %v928_v38 = vmul.f32 %v1515_v46, %v1887_v35  ;;  %v536_v2 = vmul.f32 %v796_v53, %v1449_v6 }
  0x94   :  { %v470_v0 = vadd.f32 %v438_v58, %v372_v3  ;;  %v763_v50 = vadd.f32 %v731_v59, %v665_v33  ;;  %v275_v9 = vadd.f32 %v243_v25, %v1347_v26  ;;  %v341_v60 = vmul.f32 %v893_v42, %v1353_v30  ;;  %v800_v33 = vld [vmem:[#allocation2 + $0x120] sm:$0xff] }
  0x95   :  { %v959_v18 = vadd.f32 %v927_v37, %v861_v49  ;;  %v1026_v39 = vmul.f32 %v1518_v47, %v1892_v23  ;;  %v634_v1 = vmul.f32 %v894_v40, %v1478_v19  ;;  %v439_v12 = vmul.f32 %v991_v7, %v1363_v36  ;;  %v1941_v59 = vld [vmem:[#allocation2 + $0x121] sm:$0xff] }
  0x96   :  { %v568_v24 = vadd.f32 %v536_v2, %v470_v0  ;;  %v862_v34 = vadd.f32 %v830_v20, %v763_v50  ;;  %v373_v16 = vadd.f32 %v341_v60, %v275_v9  ;;  %v244_v51 = vmul.f32 %v796_v53, %v1350_v28  ;;  %v1949_v50 = vld [vmem:[#allocation2 + $0x122] sm:$0xff] }
  0x97   :  { %v1057_v8 = vadd.f32 %v1025_v21, %v959_v18  ;;  %v732_v56 = vmul.f32 %v992_v11, %v1494_v32  ;;  %v831_v42 = vmul.f32 %v1510_v43, %v798_v5  ;;  %v537_v31 = vmul.f32 %v797_v45, %v1449_v6 }
  0x98   :  { %v666_v52 = vadd.f32 %v634_v1, %v568_v24  ;;  %v960_v7 = vadd.f32 %v928_v38, %v862_v34  ;;  %v471_v17 = vadd.f32 %v439_v12, %v373_v16  ;;  %v276_v61 = vadd.f32 %v244_v51, %v1347_v26 }
  0x99   :  { %1089 = vst.msk [vmem:[%s2141_s4 + $0x80] sm:$0xff] %vm99_vm0, %v1057_v8  ;;  %v342_v62 = vmul.f32 %v894_v40, %v1353_v30  ;;  %v929_v55 = vmul.f32 %v1515_v46, %v896_v10  ;;  %v1027_v15 = vmul.f32 %v1518_v47, %v1909_v54  ;;  %v635_v63 = vmul.f32 %v1887_v35, %v1478_v19 }
  0x9a   :  { %v764_v53 = vadd.f32 %v732_v56, %v666_v52  ;;  %v1058_v57 = vadd.f32 %v1026_v39, %v960_v7  ;;  %v569_v14 = vadd.f32 %v537_v31, %v471_v17  ;;  %v440_v4 = vmul.f32 %v992_v11, %v1363_v36  ;;  %v801_v31 = vld [vmem:[#allocation2 + $0x128] sm:$0xff] }
  0x9b   :  { %v374_v27 = vadd.f32 %v342_v62, %v276_v61  ;;  %v733_v40 = vmul.f32 %v1892_v23, %v1494_v32  ;;  %v832_v48 = vmul.f32 %v1510_v43, %v799_v44  ;;  %v245_v29 = vmul.f32 %v797_v45, %v1350_v28  ;;  %v899_v7 = vld [vmem:[#allocation2 + $0x129] sm:$0xff] }
  0x9c   :  { %v863_v37 = vadd.f32 %v831_v42, %v764_v53  ;;  %1090 = vst.msk [vmem:[%s2141_s4 + $0x88] sm:$0xff] %vm99_vm0, %v1058_v57  ;;  %v667_v22 = vadd.f32 %v635_v63, %v569_v14  ;;  %v930_v21 = vmul.f32 %v1515_v46, %v897_v41  ;;  %v538_v58 = vmul.f32 %v798_v5, %v1449_v6  ;;  %v997_v57 = vld [vmem:[#allocation2 + $0x12a] sm:$0xff] }
  0x9d   :  { %v472_v3 = vadd.f32 %v440_v4, %v374_v27  ;;  %v1028_v49 = vmul.f32 %v1518_v47, %v1926_v13  ;;  %v277_v45 = vadd.f32 %v245_v29, %v1347_v26  ;;  %v343_v25 = vmul.f32 %v1887_v35, %v1353_v30 }
  0x9e   :  { %v961_v11 = vadd.f32 %v929_v55, %v863_v37  ;;  %v765_v20 = vadd.f32 %v733_v40, %v667_v22  ;;  %v636_v0 = vmul.f32 %v896_v10, %v1478_v19  ;;  %v734_v2 = vmul.f32 %v1909_v54, %v1494_v32  ;;  %v802_v22 = vld [vmem:[#allocation2 + $0x138] sm:$0xff] }
  0x9f   :  { %v570_v38 = vadd.f32 %v538_v58, %v472_v3  ;;  %v375_v9 = vadd.f32 %v343_v25, %v277_v45  ;;  %v441_v60 = vmul.f32 %v1892_v23, %v1363_v36  ;;  %v246_v39 = vmul.f32 %v798_v5, %v1350_v28 }
  0xa0   :  { %v1059_v18 = vadd.f32 %v1027_v15, %v961_v11  ;;  %v864_v24 = vadd.f32 %v832_v48, %v765_v20  ;;  %v833_v35 = vmul.f32 %v1510_v43, %v800_v33  ;;  %v931_v12 = vmul.f32 %v1515_v46, %v1941_v59 }
  0xa1   :  { %v668_v1 = vadd.f32 %v636_v0, %v570_v38  ;;  %v473_v8 = vadd.f32 %v441_v60, %v375_v9  ;;  %v539_v34 = vmul.f32 %v799_v44, %v1449_v6  ;;  %v278_v16 = vadd.f32 %v246_v39, %v1347_v26  ;;  %v998_v38 = vld [vmem:[#allocation2 + $0x13a] sm:$0xff] }
  0xa2   :  { %1091 = vst.msk [vmem:[%s2141_s4 + $0x90] sm:$0xff] %vm99_vm0, %v1059_v18  ;;  %v344_v23 = vmul.f32 %v896_v10, %v1353_v30  ;;  %v962_v5 = vadd.f32 %v930_v21, %v864_v24  ;;  %v1029_v52 = vmul.f32 %v1518_v47, %v1949_v50  ;;  %v637_v56 = vmul.f32 %v897_v41, %v1478_v19  ;;  %v900_v21 = vld [vmem:[#allocation2 + $0x139] sm:$0xff] }
  0xa3   :  { %v766_v51 = vadd.f32 %v734_v2, %v668_v1  ;;  %v571_v42 = vadd.f32 %v539_v34, %v473_v8  ;;  %v442_v61 = vmul.f32 %v1909_v54, %v1363_v36  ;;  %v247_v62 = vmul.f32 %v799_v44, %v1350_v28  ;;  %v901_v8 = vld [vmem:[#allocation2 + $0x141] sm:$0xff] }
  0xa4   :  { %v376_v17 = vadd.f32 %v344_v23, %v278_v16  ;;  %v1060_v53 = vadd.f32 %v1028_v49, %v962_v5  ;;  %v735_v10 = vmul.f32 %v1926_v13, %v1494_v32  ;;  %v540_v15 = vmul.f32 %v800_v33, %v1449_v6 }
  0xa5   :  { %v865_v55 = vadd.f32 %v833_v35, %v766_v51  ;;  %v669_v63 = vadd.f32 %v637_v56, %v571_v42  ;;  %v279_v27 = vadd.f32 %v247_v62, %v1347_v26  ;;  %v345_v4 = vmul.f32 %v897_v41, %v1353_v30  ;;  %v999_v56 = vld [vmem:[#allocation2 + $0x142] sm:$0xff] }
  0xa6   :  { %v474_v14 = vadd.f32 %v442_v61, %v376_v17  ;;  %1092 = vst.msk [vmem:[%s2141_s4 + $0x98] sm:$0xff] %vm99_vm0, %v1060_v53  ;;  %v834_v44 = vmul.f32 %v1510_v43, %v801_v31  ;;  %v932_v37 = vmul.f32 %v1515_v46, %v899_v7  ;;  %v638_v40 = vmul.f32 %v1941_v59, %v1478_v19 }
  0xa7   :  { %v963_v54 = vadd.f32 %v931_v12, %v865_v55  ;;  %v767_v48 = vadd.f32 %v735_v10, %v669_v63  ;;  %v377_v3 = vadd.f32 %v345_v4, %v279_v27  ;;  %v443_v41 = vmul.f32 %v1926_v13, %v1363_v36  ;;  %v803_v12 = vld [vmem:[#allocation2 + $0x140] sm:$0xff]  ;;  %v804_v63 = vld [vmem:[#allocation2 + $0x150] sm:$0xff] }
  0xa8   :  { %v572_v29 = vadd.f32 %v540_v15, %v474_v14  ;;  %v1030_v11 = vmul.f32 %v1518_v47, %v997_v57  ;;  %v736_v49 = vmul.f32 %v1949_v50, %v1494_v32  ;;  %v248_v45 = vmul.f32 %v800_v33, %v1350_v28 }
  0xa9   :  { %v1061_v58 = vadd.f32 %v1029_v52, %v963_v54  ;;  %v866_v25 = vadd.f32 %v834_v44, %v767_v48  ;;  %v475_v0 = vadd.f32 %v443_v41, %v377_v3  ;;  %v541_v2 = vmul.f32 %v801_v31, %v1449_v6  ;;  %v902_v44 = vld [vmem:[#allocation2 + $0x151] sm:$0xff] }
  0xaa   :  { %v670_v20 = vadd.f32 %v638_v40, %v572_v29  ;;  %v835_v13 = vmul.f32 %v1510_v43, %v802_v22  ;;  %v933_v18 = vmul.f32 %v1515_v46, %v900_v21  ;;  %v280_v9 = vadd.f32 %v248_v45, %v1347_v26  ;;  %v1000_v29 = vld [vmem:[#allocation2 + $0x152] sm:$0xff] }
  0xab   :  { %1093 = vst.msk [vmem:[%s2141_s4 + $0xa0] sm:$0xff] %vm99_vm0, %v1061_v58  ;;  %v346_v33 = vmul.f32 %v1941_v59, %v1353_v30  ;;  %v964_v60 = vadd.f32 %v932_v37, %v866_v25  ;;  %v573_v24 = vadd.f32 %v541_v2, %v475_v0  ;;  %v639_v1 = vmul.f32 %v899_v7, %v1478_v19  ;;  %v805_v0 = vld [vmem:[#allocation2 + $0x158] sm:$0xff] }
  0xac   :  { %v768_v39 = vadd.f32 %v736_v49, %v670_v20  ;;  %v1031_v35 = vmul.f32 %v1518_v47, %v998_v38  ;;  %v444_v16 = vmul.f32 %v1949_v50, %v1363_v36  ;;  %v249_v23 = vmul.f32 %v801_v31, %v1350_v28  ;;  %v2029_v2 = vld [vmem:[#allocation2 + $0x159] sm:$0xff] }
  0xad   :  { %v378_v34 = vadd.f32 %v346_v33, %v280_v9  ;;  %v1062_v5 = vadd.f32 %v1030_v11, %v964_v60  ;;  %v671_v52 = vadd.f32 %v639_v1, %v573_v24  ;;  %v737_v59 = vmul.f32 %v997_v57, %v1494_v32 }
  0xae   :  { %v867_v51 = vadd.f32 %v835_v13, %v768_v39  ;;  %v542_v17 = vmul.f32 %v802_v22, %v1449_v6  ;;  %v281_v61 = vadd.f32 %v249_v23, %v1347_v26  ;;  %v347_v62 = vmul.f32 %v899_v7, %v1353_v30 }
  0xaf   :  { %v476_v42 = vadd.f32 %v444_v16, %v378_v34  ;;  %1094 = vst.msk [vmem:[%s2141_s4 + $0xa8] sm:$0xff] %vm99_vm0, %v1062_v5  ;;  %v769_v31 = vadd.f32 %v737_v59, %v671_v52  ;;  %v836_v53 = vmul.f32 %v1510_v43, %v803_v12  ;;  %v934_v55 = vmul.f32 %v1515_v46, %v901_v8 }
  0xb0   :  { %v965_v50 = vadd.f32 %v933_v18, %v867_v51  ;;  %v640_v15 = vmul.f32 %v900_v21, %v1478_v19  ;;  %v379_v14 = vadd.f32 %v347_v62, %v281_v61  ;;  %v445_v27 = vmul.f32 %v997_v57, %v1363_v36  ;;  %v806_v51 = vld [vmem:[#allocation2 + $0x168] sm:$0xff] }
  0xb1   :  { %v574_v10 = vadd.f32 %v542_v17, %v476_v42  ;;  %v868_v7 = vadd.f32 %v836_v53, %v769_v31  ;;  %v1032_v54 = vmul.f32 %v1518_v47, %v999_v56  ;;  %v250_v37 = vmul.f32 %v802_v22, %v1350_v28  ;;  %v904_v31 = vld [vmem:[#allocation2 + $0x169] sm:$0xff] }
  0xb2   :  { %v1063_v4 = vadd.f32 %v1031_v35, %v965_v50  ;;  %v738_v48 = vmul.f32 %v998_v38, %v1494_v32  ;;  %v477_v3 = vadd.f32 %v445_v27, %v379_v14  ;;  %v543_v41 = vmul.f32 %v803_v12, %v1449_v6  ;;  %v1002_v53 = vld [vmem:[#allocation2 + $0x16a] sm:$0xff] }
  0xb3   :  { %v672_v40 = vadd.f32 %v640_v15, %v574_v10  ;;  %v966_v57 = vadd.f32 %v934_v55, %v868_v7  ;;  %v837_v58 = vmul.f32 %v1510_v43, %v804_v63  ;;  %v282_v11 = vadd.f32 %v250_v37, %v1347_v26  ;;  %v807_v7 = vld [vmem:[#allocation2 + $0x170] sm:$0xff] }
  0xb4   :  { %1095 = vst.msk [vmem:[%s2141_s4 + $0xb0] sm:$0xff] %vm99_vm0, %v1063_v4  ;;  %v348_v49 = vmul.f32 %v900_v21, %v1353_v30  ;;  %v935_v45 = vmul.f32 %v1515_v46, %v902_v44  ;;  %v575_v25 = vadd.f32 %v543_v41, %v477_v3  ;;  %v641_v20 = vmul.f32 %v901_v8, %v1478_v19  ;;  %v2034_v21 = vld [vmem:[#allocation2 + $0x15a] sm:$0xff]  ;;  %v905_v41 = vld [vmem:[#allocation2 + $0x171] sm:$0xff] }
  0xb5   :  { %v770_v22 = vadd.f32 %v738_v48, %v672_v40  ;;  %v1064_v13 = vadd.f32 %v1032_v54, %v966_v57  ;;  %v1033_v18 = vmul.f32 %v1518_v47, %v1000_v29  ;;  %v446_v33 = vmul.f32 %v998_v38, %v1363_v36 }
  0xb6   :  { %v380_v9 = vadd.f32 %v348_v49, %v282_v11  ;;  %v673_v39 = vadd.f32 %v641_v20, %v575_v25  ;;  %v739_v24 = vmul.f32 %v999_v56, %v1494_v32  ;;  %v251_v1 = vmul.f32 %v803_v12, %v1350_v28  ;;  %v1003_v11 = vld [vmem:[#allocation2 + $0x172] sm:$0xff] }
  0xb7   :  { %v869_v60 = vadd.f32 %v837_v58, %v770_v22  ;;  %1096 = vst.msk [vmem:[%s2141_s4 + $0xb8] sm:$0xff] %vm99_vm0, %v1064_v13  ;;  %v838_v35 = vmul.f32 %v1510_v43, %v805_v0  ;;  %v936_v34 = vmul.f32 %v1515_v46, %v2029_v2  ;;  %v544_v38 = vmul.f32 %v804_v63, %v1449_v6 }
  0xb8   :  { %v478_v16 = vadd.f32 %v446_v33, %v380_v9  ;;  %v771_v5 = vadd.f32 %v739_v24, %v673_v39  ;;  %v283_v52 = vadd.f32 %v251_v1, %v1347_v26  ;;  %v349_v12 = vmul.f32 %v901_v8, %v1353_v30  ;;  %v808_v39 = vld [vmem:[#allocation2 + $0x180] sm:$0xff] }
  0xb9   :  { %v967_v23 = vadd.f32 %v935_v45, %v869_v60  ;;  %v1034_v59 = vmul.f32 %v1518_v47, %v2034_v21  ;;  %v642_v17 = vmul.f32 %v902_v44, %v1478_v19  ;;  %v447_v61 = vmul.f32 %v999_v56, %v1363_v36  ;;  %v906_v24 = vld [vmem:[#allocation2 + $0x181] sm:$0xff] }
  0xba   :  { %v576_v42 = vadd.f32 %v544_v38, %v478_v16  ;;  %v870_v50 = vadd.f32 %v838_v35, %v771_v5  ;;  %v381_v55 = vadd.f32 %v349_v12, %v283_v52  ;;  %v252_v10 = vmul.f32 %v804_v63, %v1350_v28 }
  0xbb   :  { %v1065_v62 = vadd.f32 %v1033_v18, %v967_v23  ;;  %v740_v14 = vmul.f32 %v1000_v29, %v1494_v32  ;;  %v839_v8 = vmul.f32 %v1510_v43, %v806_v51  ;;  %v545_v27 = vmul.f32 %v805_v0, %v1449_v6 }
  0xbc   :  { %v674_v15 = vadd.f32 %v642_v17, %v576_v42  ;;  %v968_v56 = vadd.f32 %v936_v34, %v870_v50  ;;  %v479_v4 = vadd.f32 %v447_v61, %v381_v55  ;;  %v284_v54 = vadd.f32 %v252_v10, %v1347_v26 }
  0xbd   :  { %1097 = vst.msk [vmem:[%s2141_s4 + $0xc0] sm:$0xff] %vm99_vm0, %v1065_v62  ;;  %v350_v37 = vmul.f32 %v902_v44, %v1353_v30  ;;  %v937_v40 = vmul.f32 %v1515_v46, %v904_v31  ;;  %v1035_v48 = vmul.f32 %v1518_v47, %v1002_v53  ;;  %v643_v3 = vmul.f32 %v2029_v2, %v1478_v19 }
  0xbe   :  { %v772_v63 = vadd.f32 %v740_v14, %v674_v15  ;;  %v1066_v57 = vadd.f32 %v1034_v59, %v968_v56  ;;  %v577_v58 = vadd.f32 %v545_v27, %v479_v4  ;;  %v448_v22 = vmul.f32 %v1000_v29, %v1363_v36  ;;  %v809_v27 = vld [vmem:[#allocation2 + $0x188] sm:$0xff] }
  0xbf   :  { %v382_v49 = vadd.f32 %v350_v37, %v284_v54  ;;  %v741_v25 = vmul.f32 %v2034_v21, %v1494_v32  ;;  %v840_v44 = vmul.f32 %v1510_v43, %v807_v7  ;;  %v253_v20 = vmul.f32 %v805_v0, %v1350_v28 }
  0xc0   :  { %v871_v45 = vadd.f32 %v839_v8, %v772_v63  ;;  %1098 = vst.msk [vmem:[%s2141_s4 + $0xc8] sm:$0xff] %vm99_vm0, %v1066_v57  ;;  %v675_v13 = vadd.f32 %v643_v3, %v577_v58  ;;  %v938_v18 = vmul.f32 %v1515_v46, %v905_v41  ;;  %v546_v33 = vmul.f32 %v806_v51, %v1449_v6  ;;  %v907_v3 = vld [vmem:[#allocation2 + $0x189] sm:$0xff] }
  0xc1   :  { %v480_v9 = vadd.f32 %v448_v22, %v382_v49  ;;  %v1036_v60 = vmul.f32 %v1518_v47, %v1003_v11  ;;  %v285_v1 = vadd.f32 %v253_v20, %v1347_v26  ;;  %v351_v0 = vmul.f32 %v2029_v2, %v1353_v30  ;;  %v1004_v2 = vld [vmem:[#allocation2 + $0x182] sm:$0xff]  ;;  %v810_v22 = vld [vmem:[#allocation2 + $0x198] sm:$0xff] }
  0xc2   :  { %v969_v29 = vadd.f32 %v937_v40, %v871_v45  ;;  %v773_v35 = vadd.f32 %v741_v25, %v675_v13  ;;  %v644_v16 = vmul.f32 %v904_v31, %v1478_v19  ;;  %v742_v38 = vmul.f32 %v1002_v53, %v1494_v32 }
  0xc3   :  { %v578_v34 = vadd.f32 %v546_v33, %v480_v9  ;;  %v383_v5 = vadd.f32 %v351_v0, %v285_v1  ;;  %v449_v52 = vmul.f32 %v2034_v21, %v1363_v36  ;;  %v254_v12 = vmul.f32 %v806_v51, %v1350_v28 }
  0xc4   :  { %v1067_v23 = vadd.f32 %v1035_v48, %v969_v29  ;;  %v872_v59 = vadd.f32 %v840_v44, %v773_v35  ;;  %v841_v17 = vmul.f32 %v1510_v43, %v808_v39  ;;  %v939_v61 = vmul.f32 %v1515_v46, %v906_v24  ;;  %v1005_v44 = vld [vmem:[#allocation2 + $0x18a] sm:$0xff] }
  0xc5   :  { %v676_v42 = vadd.f32 %v644_v16, %v578_v34  ;;  %v481_v62 = vadd.f32 %v449_v52, %v383_v5  ;;  %v547_v50 = vmul.f32 %v807_v7, %v1449_v6  ;;  %v286_v55 = vadd.f32 %v254_v12, %v1347_v26  ;;  %v1006_v34 = vld [vmem:[#allocation2 + $0x19a] sm:$0xff] }
  0xc6   :  { %1099 = vst.msk [vmem:[%s2141_s4 + $0xd0] sm:$0xff] %vm99_vm0, %v1067_v23  ;;  %v352_v21 = vmul.f32 %v904_v31, %v1353_v30  ;;  %v970_v51 = vadd.f32 %v938_v18, %v872_v59  ;;  %v645_v15 = vmul.f32 %v905_v41, %v1478_v19  ;;  %v450_v14 = vmul.f32 %v1002_v53, %v1363_v36  ;;  %v909_v12 = vld [vmem:[#allocation2 + $0x1a1] sm:$0xff] }
  0xc7   :  { %v774_v10 = vadd.f32 %v742_v38, %v676_v42  ;;  %v579_v8 = vadd.f32 %v547_v50, %v481_v62  ;;  %v548_v4 = vmul.f32 %v808_v39, %v1449_v6  ;;  %v255_v54 = vmul.f32 %v807_v7, %v1350_v28 }
  0xc8   :  { %v384_v56 = vadd.f32 %v352_v21, %v286_v55  ;;  %v1068_v37 = vadd.f32 %v1036_v60, %v970_v51  ;;  %v1037_v40 = vmul.f32 %v1518_v47, %v1004_v2  ;;  %v743_v48 = vmul.f32 %v1003_v11, %v1494_v32  ;;  %v908_v60 = vld [vmem:[#allocation2 + $0x199] sm:$0xff] }
  0xc9   :  { %v873_v63 = vadd.f32 %v841_v17, %v774_v10  ;;  %v677_v31 = vadd.f32 %v645_v15, %v579_v8  ;;  %v287_v58 = vadd.f32 %v255_v54, %v1347_v26  ;;  %v353_v53 = vmul.f32 %v905_v41, %v1353_v30  ;;  %v1007_v17 = vld [vmem:[#allocation2 + $0x1a2] sm:$0xff] }
  0xca   :  { %v482_v57 = vadd.f32 %v450_v14, %v384_v56  ;;  %1100 = vst.msk [vmem:[%s2141_s4 + $0xd8] sm:$0xff] %vm99_vm0, %v1068_v37  ;;  %v842_v28 = vmul.f32 %v1510_v43, %v809_v27  ;;  %v646_v7 = vmul.f32 %v906_v24, %v1478_v19  ;;  %v451_v45 = vmul.f32 %v1003_v11, %v1363_v36  ;;  %v811_v11 = vld [vmem:[#allocation2 + $0x1a0] sm:$0xff] }
  0xcb   :  { %v971_v49 = vadd.f32 %v939_v61, %v873_v63  ;;  %v775_v25 = vadd.f32 %v743_v48, %v677_v31  ;;  %v385_v13 = vadd.f32 %v353_v53, %v287_v58  ;;  %v549_v26 = vmul.f32 %v809_v27, %v1449_v6 }
  0xcc   :  { %v580_v20 = vadd.f32 %v548_v4, %v482_v57  ;;  %v940_v41 = vmul.f32 %v1515_v46, %v907_v3  ;;  %v744_v18 = vmul.f32 %v1004_v2, %v1494_v32  ;;  %v843_v29 = vmul.f32 %v1510_v43, %v810_v22 }
  0xcd   :  { %v1069_v30 = vadd.f32 %v1037_v40, %v971_v49  ;;  %v874_v9 = vadd.f32 %v842_v28, %v775_v25  ;;  %v483_v39 = vadd.f32 %v451_v45, %v385_v13  ;;  %v1038_v36 = vmul.f32 %v1518_v47, %v1005_v44 }
  0xce   :  { %v678_v33 = vadd.f32 %v646_v7, %v580_v20  ;;  %v647_v0 = vmul.f32 %v907_v3, %v1478_v19  ;;  %v941_v35 = vmul.f32 %v1515_v46, %v908_v60  ;;  %v745_v16 = vmul.f32 %v1005_v44, %v1494_v32 }
  0xcf   :  { %1101 = vst.msk [vmem:[%s2141_s4 + $0xe0] sm:$0xff] %vm99_vm0, %v1069_v30  ;;  %v972_v6 = vadd.f32 %v940_v41, %v874_v9  ;;  %v581_v1 = vadd.f32 %v549_v26, %v483_v39  ;;  %v844_v52 = vmul.f32 %v1510_v43, %v811_v11  ;;  %v1039_v42 = vmul.f32 %v1518_v47, %v1006_v34 }
  0xd0   :  { %v776_v24 = vadd.f32 %v744_v18, %v678_v33  ;;  %v942_v32 = vmul.f32 %v1515_v46, %v909_v12  ;;  %v1040_v62 = vmul.f32 %v1518_v47, %v1007_v17 }
  0xd1   :  { %v1070_v38 = vadd.f32 %v1038_v36, %v972_v6  ;;  %v679_v5 = vadd.f32 %v647_v0, %v581_v1 }
  0xd2   :  { %v875_v23 = vadd.f32 %v843_v29, %v776_v24 }
  0xd3   :  { %1102 = vst.msk [vmem:[%s2141_s4 + $0xe8] sm:$0xff] %vm99_vm0, %v1070_v38  ;;  %v777_v19 = vadd.f32 %v745_v16, %v679_v5 }
  0xd4   :  { %v973_v59 = vadd.f32 %v941_v35, %v875_v23 }
  0xd5   :  { %v876_v2 = vadd.f32 %v844_v52, %v777_v19 }
  0xd6   :  { %v1071_v61 = vadd.f32 %v1039_v42, %v973_v59 }
  0xd7   :  { %v974_v43 = vadd.f32 %v942_v32, %v876_v2 }
  0xd8   :  { %1103 = vst.msk [vmem:[%s2141_s4 + $0xf0] sm:$0xff] %vm99_vm0, %v1071_v61 }
  0xd9   :  { %v1072_v50 = vadd.f32 %v1040_v62, %v974_v43 }
  0xdb   :  { %1104 = vst.msk [vmem:[%s2141_s4 + $0xf8] sm:$0xff] %vm99_vm0, %v1072_v50 }
  0xdc   :  { %1109 = vsyncpa [#allocation5], 1 }

</bundles_post_ra>
